<compile_context>
chip_gen: v7x
topology: tpu7x:2x2x1
jax: 0.10.0
libtpu: 0.0.40
codegen_flags: <defaults>
</compile_context>

<pallas_src>
import functools

import jax
import jax.numpy as jnp
from jax.experimental import pallas as pl
from jax.experimental.pallas import tpu as pltpu


def _round_up(x, m):
    return ((x + m - 1) // m) * m


def _pick_tm(M):
    """M tile: single tile for small M; otherwise >=2 tiles (v7x megacore)
    of up to 512 rows (v5e step-overhead amortization), multiples of 16
    (bf16 packs 16 sublanes per vreg)."""
    m16 = _round_up(M, 16)
    if m16 <= 256:
        return m16
    n_tiles = max(2, -(-m16 // 512))
    return _round_up(-(-m16 // n_tiles), 16)


# ----------------------------------------------------------------------------
# Kernel 1: tiled, K-accumulating  A @ W  + shift  (+ optional ReLU)
#   (BN scale already folded into W's columns at prep time.)
# ----------------------------------------------------------------------------
def _matmul_shift_kernel(a_ref, wt_ref, shift_ref, o_ref, acc_ref, *, relu):
    @pl.when(pl.program_id(2) == 0)
    def _():
        acc_ref[...] = jnp.zeros_like(acc_ref)

    acc_ref[...] += jnp.dot(a_ref[...], wt_ref[...],
                            preferred_element_type=jnp.float32)

    @pl.when(pl.program_id(2) == pl.num_programs(2) - 1)
    def _():
        out = acc_ref[...] + shift_ref[...]
        if relu:
            out = jnp.maximum(out, 0.0)
        o_ref[...] = out.astype(o_ref.dtype)


def fused_matmul(a_p, wt, shift, *, tm, relu, out_dtype):
    """a_p: (M_pad, K_pad) bf16 (already padded by the producer);
    wt: (K_pad, N_pad) bf16 (scale-folded); shift: (1, N_pad) f32."""
    M_pad, K_pad = a_p.shape
    K_pad_w, N_pad = wt.shape
    assert K_pad == K_pad_w and M_pad % tm == 0
    tn = 128                                    # never shrink below 128
    tk = K_pad if K_pad <= 1024 else 512        # conv K's here fit in one step
    gm, gn, gk = M_pad // tm, N_pad // tn, K_pad // tk

    cost = pl.CostEstimate(
        flops=2 * M_pad * N_pad * K_pad, transcendentals=0,
        bytes_accessed=(a_p.size * 2 + wt.size * 2 + shift.size * 4
                        + M_pad * N_pad * jnp.dtype(out_dtype).itemsize))

    kern = functools.partial(_matmul_shift_kernel, relu=relu)
    return pl.pallas_call(
        kern,
        out_shape=jax.ShapeDtypeStruct((M_pad, N_pad), out_dtype),
        grid=(gm, gn, gk),
        in_specs=[
            pl.BlockSpec((tm, tk), lambda i, j, k: (i, k)),
            pl.BlockSpec((tk, tn), lambda i, j, k: (k, j)),
            pl.BlockSpec((1, tn), lambda i, j, k: (0, j)),
        ],
        out_specs=pl.BlockSpec((tm, tn), lambda i, j, k: (i, j)),
        scratch_shapes=[pltpu.VMEM((tm, tn), jnp.float32)],
        compiler_params=pltpu.CompilerParams(
            dimension_semantics=("parallel", "parallel", "arbitrary"),
            vmem_limit_bytes=32 * 1024 * 1024),
        cost_estimate=cost,
    )(a_p, wt, shift)


# ----------------------------------------------------------------------------
# Kernel 2: fused conv3 (block-diagonal) -> ReLU -> fc1 -> ReLU -> fc2
#   All intermediates live in VMEM; one pallas_call for the last 3 layers.
# ----------------------------------------------------------------------------
def _conv3_fc_kernel(p_ref, w3_ref, s3_ref, w1_ref, b1_ref, w2_ref, b2_ref,
                     o_ref):
    h3 = jnp.dot(p_ref[...], w3_ref[...], preferred_element_type=jnp.float32)
    h3 = jnp.maximum(h3 + s3_ref[...], 0.0)          # NHWC-flattened conv3 out
    h1 = jnp.dot(h3.astype(w1_ref.dtype), w1_ref[...],
                 preferred_element_type=jnp.float32)
    h1 = jnp.maximum(h1 + b1_ref[...], 0.0)
    out = jnp.dot(h1.astype(w2_ref.dtype), w2_ref[...],
                  preferred_element_type=jnp.float32)
    o_ref[...] = (out + b2_ref[...]).astype(o_ref.dtype)


def fused_conv3_fc(p, w3bd, s3, w1t, b1, w2t, b2):
    """p: (B, P3*K3) bf16 super-patch rows.  Returns (B, N2_pad) f32."""
    B, K3p = p.shape
    _, H3 = w3bd.shape
    _, H1 = w1t.shape
    _, N2_pad = w2t.shape
    tm = min(128, _round_up(B, 16))      # bound f32 intermediates (no spill)
    B_pad = _round_up(B, tm)
    p_p = jnp.pad(p, ((0, B_pad - B), (0, 0)))
    gm = B_pad // tm

    cost = pl.CostEstimate(
        flops=2 * B_pad * (K3p * H3 + H3 * H1 + H1 * N2_pad),
        transcendentals=0,
        bytes_accessed=(p_p.size * 2 + w3bd.size * 2 + w1t.size * 2
                        + w2t.size * 2 + B_pad * N2_pad * 4))

    out = pl.pallas_call(
        _conv3_fc_kernel,
        out_shape=jax.ShapeDtypeStruct((B_pad, N2_pad), jnp.float32),
        grid=(gm,),
        in_specs=[
            pl.BlockSpec((tm, K3p), lambda i: (i, 0)),
            pl.BlockSpec((K3p, H3), lambda i: (0, 0)),
            pl.BlockSpec((1, H3), lambda i: (0, 0)),
            pl.BlockSpec((H3, H1), lambda i: (0, 0)),
            pl.BlockSpec((1, H1), lambda i: (0, 0)),
            pl.BlockSpec((H1, N2_pad), lambda i: (0, 0)),
            pl.BlockSpec((1, N2_pad), lambda i: (0, 0)),
        ],
        out_specs=pl.BlockSpec((tm, N2_pad), lambda i: (i, 0)),
        compiler_params=pltpu.CompilerParams(
            dimension_semantics=("parallel",),
            vmem_limit_bytes=32 * 1024 * 1024),
        cost_estimate=cost,
    )(p_p, w3bd, s3, w1t, b1, w2t, b2)
    return out[:B]


# ----------------------------------------------------------------------------
# Kernel 3 (fallback when conv3's spatial output is large): fused fc1+fc2
# ----------------------------------------------------------------------------
def _fc_kernel(x_ref, w1_ref, b1_ref, w2_ref, b2_ref, o_ref):
    h = jnp.dot(x_ref[...], w1_ref[...], preferred_element_type=jnp.float32)
    h = jnp.maximum(h + b1_ref[...], 0.0)
    out = jnp.dot(h.astype(w2_ref.dtype), w2_ref[...],
                  preferred_element_type=jnp.float32)
    o_ref[...] = (out + b2_ref[...]).astype(o_ref.dtype)


def fused_fc(x, w1t, b1, w2t, b2):
    B, K1 = x.shape
    K1_pad, H = w1t.shape
    _, N2_pad = w2t.shape
    tm = min(128, _round_up(B, 16))
    B_pad = _round_up(B, tm)
    x_p = jnp.pad(x, ((0, B_pad - B), (0, K1_pad - K1)))
    gm = B_pad // tm
    out = pl.pallas_call(
        _fc_kernel,
        out_shape=jax.ShapeDtypeStruct((B_pad, N2_pad), jnp.float32),
        grid=(gm,),
        in_specs=[
            pl.BlockSpec((tm, K1_pad), lambda i: (i, 0)),
            pl.BlockSpec((K1_pad, H), lambda i: (0, 0)),
            pl.BlockSpec((1, H), lambda i: (0, 0)),
            pl.BlockSpec((H, N2_pad), lambda i: (0, 0)),
            pl.BlockSpec((1, N2_pad), lambda i: (0, 0)),
        ],
        out_specs=pl.BlockSpec((tm, N2_pad), lambda i: (i, 0)),
        compiler_params=pltpu.CompilerParams(
            dimension_semantics=("parallel",),
            vmem_limit_bytes=32 * 1024 * 1024),
    )(x_p, w1t, b1, w2t, b2)
    return out[:B]


# ----------------------------------------------------------------------------
# im2col: strided slices + concat (no gather); columns ordered (kh, kw, c)
# ----------------------------------------------------------------------------
def im2col_nhwc(x, k, s):
    """x: (B, H, W, C) -> (B*OH*OW, k*k*C); rows ordered (b, oh, ow)."""
    B, H, W, C = x.shape
    OH = (H - k) // s + 1
    OW = (W - k) // s + 1
    cols = []
    for kh in range(k):
        for kw in range(k):
            cols.append(x[:, kh:kh + (OH - 1) * s + 1:s,
                          kw:kw + (OW - 1) * s + 1:s, :])
    patches = jnp.concatenate(cols, axis=-1)        # (B, OH, OW, k*k*C)
    return patches.reshape(B * OH * OW, k * k * C), OH, OW


def conv_layer(h, layer):
    """One conv+BN+ReLU layer: XLA im2col (bf16, padded once) + Pallas matmul."""
    B = h.shape[0]
    patches, OH, OW = im2col_nhwc(h, layer["k"], layer["s"])
    M, K = patches.shape
    K_pad = layer["wt"].shape[0]
    tm = _pick_tm(M)
    M_pad = _round_up(M, tm)
    patches = jnp.pad(patches, ((0, M_pad - M), (0, K_pad - K)))
    y = fused_matmul(patches, layer["wt"], layer["shift"], tm=tm, relu=True,
                     out_dtype=jnp.bfloat16)
    return y[:M, :layer["cout"]].reshape(B, OH, OW, layer["cout"])


# ----------------------------------------------------------------------------
# Parameter preparation (one time: fold BN into weights, transpose, pad, cast)
# ----------------------------------------------------------------------------
_CONV_CFGS = [("conv1", 8, 4), ("conv2", 4, 2), ("conv3", 3, 1)]
_MAX_FUSED_P3 = 8   # fuse conv3 into the FC kernel only when its spatial
                    # output is small (block-diagonal weight stays tiny)


def _fold_bn(wgt, b, gamma, beta, mean, var, eps):
    """(cout,cin,k,k) torch weight -> (k*k*cin, cout) f32 with BN scale folded,
    plus the (cout,) shift (conv bias + BN folded)."""
    cout, cin, k, _ = wgt.shape
    scale = gamma / jnp.sqrt(var + eps)
    shift = (b - mean) * scale + beta
    wt = wgt.transpose(2, 3, 1, 0).reshape(k * k * cin, cout) * scale[None, :]
    return wt, shift


def prepare_params(raw, input_shape, n_actions, eps=1e-5):
    C, H, W = input_shape
    prep = {"conv": [], "n_actions": n_actions}
    h, w, cin = H, W, C
    folded = []
    for name, k, s in _CONV_CFGS:
        wt, shift = _fold_bn(*raw[name], eps)
        folded.append((name, k, s, wt.shape[1], wt, shift))
        h = (h - k) // s + 1
        w = (w - k) // s + 1
        cin = wt.shape[1]
    OH3, OW3, C3 = h, w, cin
    P3 = OH3 * OW3
    conv_out = C3 * P3
    prep["fuse_conv3"] = P3 <= _MAX_FUSED_P3

    def pack_conv(k, s, cout, wt, shift):
        K = wt.shape[0]
        K128 = _round_up(K, 128)
        K_pad = K128 if K128 <= 1024 else _round_up(K, 512)   # conv3: 576->640
        N_pad = _round_up(cout, 128)
        wt_p = jnp.pad(wt, ((0, K_pad - K), (0, N_pad - cout))).astype(jnp.bfloat16)
        shift_p = jnp.pad(shift, (0, N_pad - cout)).reshape(1, N_pad).astype(jnp.float32)
        return dict(k=k, s=s, cout=cout, wt=wt_p, shift=shift_p)

    n_plain = 2 if prep["fuse_conv3"] else 3
    for (_, k, s, cout, wt, shift) in folded[:n_plain]:
        prep["conv"].append(pack_conv(k, s, cout, wt, shift))

    # FC weights; fc1 columns permuted from torch NCHW flatten to NHWC flatten.
    fc1_w, fc1_b = raw["fc1_w"], raw["fc1_b"]
    fc2_w, fc2_b = raw["fc2_w"], raw["fc2_b"]
    hid = fc1_w.shape[0]
    fc1_w_nhwc = fc1_w.reshape(hid, C3, OH3, OW3).transpose(0, 2, 3, 1)
    fc1_w_nhwc = fc1_w_nhwc.reshape(hid, conv_out)
    N2_pad = _round_up(n_actions, 128)
    prep["fc1_b"] = fc1_b.reshape(1, hid).astype(jnp.float32)
    prep["fc2_wt"] = jnp.pad(fc2_w.T,
                             ((0, 0), (0, N2_pad - n_actions))).astype(jnp.bfloat16)
    prep["fc2_b"] = jnp.pad(fc2_b, (0, N2_pad - n_actions)
                            ).reshape(1, N2_pad).astype(jnp.float32)

    if prep["fuse_conv3"]:
        _, k3, s3, c3, wt3, shift3 = folded[2]
        prep["k3"], prep["s3"] = k3, s3
        # Block-diagonal conv3 weight: (P3*K3, P3*C3).  Applied to the per-batch
        # super-patch row it yields the NHWC-flattened conv3 output directly.
        prep["w3bd"] = jnp.kron(jnp.eye(P3, dtype=wt3.dtype), wt3).astype(jnp.bfloat16)
        prep["shift3"] = jnp.tile(shift3, P3).reshape(1, P3 * c3).astype(jnp.float32)
        prep["fc1_wt"] = fc1_w_nhwc.T.astype(jnp.bfloat16)          # (conv_out, 512)
    else:
        K1_pad = _round_up(conv_out, 128)
        prep["fc1_wt"] = jnp.pad(fc1_w_nhwc.T,
                                 ((0, K1_pad - conv_out), (0, 0))).astype(jnp.bfloat16)
    return prep


# ----------------------------------------------------------------------------
# DQN forward (noisy_net=False, eval-mode BN)
# ----------------------------------------------------------------------------
def dqn_forward(prep, x_nchw):
    B = x_nchw.shape[0]
    h = jnp.transpose(x_nchw, (0, 2, 3, 1)).astype(jnp.bfloat16)  # one transpose/cast
    for layer in prep["conv"]:
        h = conv_layer(h, layer)
    if prep["fuse_conv3"]:
        patches3, _, _ = im2col_nhwc(h, prep["k3"], prep["s3"])    # (B*P3, K3)
        p = patches3.reshape(B, -1)                                # (B, P3*K3)
        q = fused_conv3_fc(p, prep["w3bd"], prep["shift3"],
                           prep["fc1_wt"], prep["fc1_b"],
                           prep["fc2_wt"], prep["fc2_b"])
    else:
        flat = h.reshape(B, -1)                 # NHWC flatten (fc1 pre-permuted)
        q = fused_fc(flat, prep["fc1_wt"], prep["fc1_b"],
                     prep["fc2_wt"], prep["fc2_b"])
    return q[:, :prep["n_actions"]]


# ----------------------------------------------------------------------------
# Raw (PyTorch-layout) parameter init
# ----------------------------------------------------------------------------
def init_raw_params(key, in_ch, n_actions, conv_out_size):
    def u(k, shape, scale=0.05):
        return jax.random.uniform(k, shape, jnp.float32, -scale, scale)

    ks = list(jax.random.split(key, 24))
    params = {}
    conv_cfgs = [("conv1", in_ch, 32, 8), ("conv2", 32, 64, 4), ("conv3", 64, 64, 3)]
    i = 0
    for name, cin, cout, k in conv_cfgs:
        wgt = u(ks[i], (cout, cin, k, k)); i += 1
        b = u(ks[i], (cout,)); i += 1
        gamma = 1.0 + u(ks[i], (cout,), 0.1); i += 1
        beta = u(ks[i], (cout,), 0.1); i += 1
        mean = u(ks[i], (cout,), 0.1); i += 1
        var = 1.0 + jnp.abs(u(ks[i], (cout,), 0.1)); i += 1
        params[name] = (wgt, b, gamma, beta, mean, var)
    params["fc1_w"] = u(ks[i], (512, conv_out_size)); i += 1
    params["fc1_b"] = u(ks[i], (512,)); i += 1
    params["fc2_w"] = u(ks[i], (n_actions, 512)); i += 1
    params["fc2_b"] = u(ks[i], (n_actions,)); i += 1
    return params


if __name__ == "__main__":
    key = jax.random.PRNGKey(0)
    k_x, k_p = jax.random.split(key)

    # Small Pong-like input: batch=2, 4 stacked frames, 44x44 spatial
    # (the conv stack 8/4 -> 4/2 -> 3/1 needs spatial >= 36).
    B, C, H, W = 2, 4, 44, 44
    n_actions = 6

    def odim(h, k, s):
        return (h - k) // s + 1

    oh = odim(odim(odim(H, 8, 4), 4, 2), 3, 1)
    ow = odim(odim(odim(W, 8, 4), 4, 2), 3, 1)
    conv_out_size = 64 * oh * ow  # mirrors DQN._get_conv_out

    x = jax.random.normal(k_x, (B, C, H, W), jnp.float32)
    raw = init_raw_params(k_p, C, n_actions, conv_out_size)
    prep = prepare_params(raw, (C, H, W), n_actions)

    fwd = jax.jit(functools.partial(dqn_forward, prep))
    q_values = jax.block_until_ready(fwd(x))

    assert q_values.shape == (B, n_actions), q_values.shape
    assert jnp.all(jnp.isfinite(q_values))
    print("KERNEL_OK")
</pallas_src>

<mosaic_0001>
module attributes {stable_mosaic.version = 11 : i64} {
  func.func @_matmul_shift_kernel(%arg0: i32, %arg1: i32, %arg2: i32, %arg3: memref<208x256xbf16, #tpu.memory_space<vmem>>, %arg4: memref<256x128xbf16, #tpu.memory_space<vmem>>, %arg5: memref<1x128xf32, #tpu.memory_space<vmem>>, %arg6: memref<208x128xbf16, #tpu.memory_space<vmem>>, %arg7: memref<208x128xf32, #tpu.memory_space<vmem>>) attributes {dimension_semantics = [#tpu.dimension_semantics<parallel>, #tpu.dimension_semantics<parallel>, #tpu.dimension_semantics<arbitrary>], iteration_bounds = array<i64: 1, 1, 1>, scalar_prefetch = 0 : i64, scratch_operands = 1 : i64, tpu.core_type = #tpu.core_type<tc>, window_params = [{transform_indices = @transform_0, window_bounds = array<i64: 208, 256>}, {transform_indices = @transform_1, window_bounds = array<i64: 256, 128>}, {transform_indices = @transform_2, window_bounds = array<i64: 1, 128>}, {transform_indices = @transform_3, window_bounds = array<i64: 208, 128>}]} {
    %c0_i32 = arith.constant 0 : i32
    %0 = arith.cmpi eq, %arg2, %c0_i32 : i32
    %1 = arith.extui %0 : i1 to i32
    %c0_i32_0 = arith.constant 0 : i32
    %2 = arith.cmpi ne, %1, %c0_i32_0 : i32
    scf.if %2 {
      %cst_10 = arith.constant 0.000000e+00 : f32
      %12 = vector.broadcast %cst_10 : f32 to vector<208x128xf32>
      %c0_11 = arith.constant 0 : index
      %c0_12 = arith.constant 0 : index
      %13 = vector.load %arg7[%c0_11, %c0_12] : memref<208x128xf32, #tpu.memory_space<vmem>>, vector<208x128xf32>
      tpu.vector_store %arg7[%c0_11, %c0_12], %12 {strides = array<i32>} : memref<208x128xf32, #tpu.memory_space<vmem>>, vector<208x128xf32>,
    } else {
    }
    %c0 = arith.constant 0 : index
    %c0_1 = arith.constant 0 : index
    %3 = vector.load %arg7[%c0, %c0_1] : memref<208x128xf32, #tpu.memory_space<vmem>>, vector<208x128xf32>
    %c0_2 = arith.constant 0 : index
    %c0_3 = arith.constant 0 : index
    %4 = vector.load %arg3[%c0_2, %c0_3] : memref<208x256xbf16, #tpu.memory_space<vmem>>, vector<208x256xbf16>
    %c0_4 = arith.constant 0 : index
    %c0_5 = arith.constant 0 : index
    %5 = vector.load %arg4[%c0_4, %c0_5] : memref<256x128xbf16, #tpu.memory_space<vmem>>, vector<256x128xbf16>
    %cst = arith.constant dense<0.000000e+00> : vector<208x128xf32>
    %6 = tpu.matmul %4, %5, %cst {dimension_numbers = #tpu.dot_dimension_numbers<[1], [0], [0], [1], [0, 0, 1, 1], [], []>} : vector<208x256xbf16>, vector<256x128xbf16>, vector<208x128xf32> -> vector<208x128xf32>
    %7 = arith.addf %3, %6 : vector<208x128xf32>
    %c0_6 = arith.constant 0 : index
    %c0_7 = arith.constant 0 : index
    %8 = vector.load %arg7[%c0_6, %c0_7] : memref<208x128xf32, #tpu.memory_space<vmem>>, vector<208x128xf32>
    tpu.vector_store %arg7[%c0_6, %c0_7], %7 {strides = array<i32>} : memref<208x128xf32, #tpu.memory_space<vmem>>, vector<208x128xf32>,
    %c0_i32_8 = arith.constant 0 : i32
    %9 = arith.cmpi eq, %arg2, %c0_i32_8 : i32
    %10 = arith.extui %9 : i1 to i32
    %c0_i32_9 = arith.constant 0 : i32
    %11 = arith.cmpi ne, %10, %c0_i32_9 : i32
    scf.if %11 {
      %c0_10 = arith.constant 0 : index
      %c0_11 = arith.constant 0 : index
      %12 = vector.load %arg7[%c0_10, %c0_11] : memref<208x128xf32, #tpu.memory_space<vmem>>, vector<208x128xf32>
      %c0_12 = arith.constant 0 : index
      %c0_13 = arith.constant 0 : index
      %13 = vector.load %arg5[%c0_12, %c0_13] : memref<1x128xf32, #tpu.memory_space<vmem>>, vector<1x128xf32>
      %14 = vector.broadcast %13 : vector<1x128xf32> to vector<208x128xf32>
      %15 = arith.addf %12, %14 : vector<208x128xf32>
      %cst_14 = arith.constant 0.000000e+00 : f32
      %16 = vector.broadcast %cst_14 : f32 to vector<208x128xf32>
      %17 = arith.maximumf %15, %16 : vector<208x128xf32>
      %18 = arith.truncf %17 : vector<208x128xf32> to vector<208x128xbf16>
      %c0_15 = arith.constant 0 : index
      %c0_16 = arith.constant 0 : index
      %19 = vector.load %arg6[%c0_15, %c0_16] : memref<208x128xbf16, #tpu.memory_space<vmem>>, vector<208x128xbf16>
      tpu.vector_store %arg6[%c0_15, %c0_16], %18 {strides = array<i32>} : memref<208x128xbf16, #tpu.memory_space<vmem>>, vector<208x128xbf16>,
    } else {
    }
    return
  }
  func.func @transform_0(%arg0: i32, %arg1: i32, %arg2: i32) -> (i32, i32) {
    %c0_i32 = arith.constant 0 : i32
    return %arg0, %arg2 : i32, i32
  }
  func.func @transform_1(%arg0: i32, %arg1: i32, %arg2: i32) -> (i32, i32) {
    %c0_i32 = arith.constant 0 : i32
    return %arg2, %arg1 : i32, i32
  }
  func.func @transform_2(%arg0: i32, %arg1: i32, %arg2: i32) -> (i32, i32) {
    %c0_i32 = arith.constant 0 : i32
    %c0_i32_0 = arith.constant 0 : i32
    return %c0_i32, %arg1 : i32, i32
  }
  func.func @transform_3(%arg0: i32, %arg1: i32, %arg2: i32) -> (i32, i32) {
    %c0_i32 = arith.constant 0 : i32
    return %arg0, %arg1 : i32, i32
  }
}

module attributes {stable_mosaic.version = 11 : i64} {
  func.func @_matmul_shift_kernel(%arg0: i32, %arg1: i32, %arg2: i32, %arg3: memref<32x512xbf16, #tpu.memory_space<vmem>>, %arg4: memref<512x128xbf16, #tpu.memory_space<vmem>>, %arg5: memref<1x128xf32, #tpu.memory_space<vmem>>, %arg6: memref<32x128xbf16, #tpu.memory_space<vmem>>, %arg7: memref<32x128xf32, #tpu.memory_space<vmem>>) attributes {dimension_semantics = [#tpu.dimension_semantics<parallel>, #tpu.dimension_semantics<parallel>, #tpu.dimension_semantics<arbitrary>], iteration_bounds = array<i64: 1, 1, 1>, scalar_prefetch = 0 : i64, scratch_operands = 1 : i64, tpu.core_type = #tpu.core_type<tc>, window_params = [{transform_indices = @transform_0, window_bounds = array<i64: 32, 512>}, {transform_indices = @transform_1, window_bounds = array<i64: 512, 128>}, {transform_indices = @transform_2, window_bounds = array<i64: 1, 128>}, {transform_indices = @transform_3, window_bounds = array<i64: 32, 128>}]} {
    %c0_i32 = arith.constant 0 : i32
    %0 = arith.cmpi eq, %arg2, %c0_i32 : i32
    %1 = arith.extui %0 : i1 to i32
    %c0_i32_0 = arith.constant 0 : i32
    %2 = arith.cmpi ne, %1, %c0_i32_0 : i32
    scf.if %2 {
      %cst_10 = arith.constant 0.000000e+00 : f32
      %12 = vector.broadcast %cst_10 : f32 to vector<32x128xf32>
      %c0_11 = arith.constant 0 : index
      %c0_12 = arith.constant 0 : index
      %13 = vector.load %arg7[%c0_11, %c0_12] : memref<32x128xf32, #tpu.memory_space<vmem>>, vector<32x128xf32>
      tpu.vector_store %arg7[%c0_11, %c0_12], %12 {strides = array<i32>} : memref<32x128xf32, #tpu.memory_space<vmem>>, vector<32x128xf32>,
    } else {
    }
    %c0 = arith.constant 0 : index
    %c0_1 = arith.constant 0 : index
    %3 = vector.load %arg7[%c0, %c0_1] : memref<32x128xf32, #tpu.memory_space<vmem>>, vector<32x128xf32>
    %c0_2 = arith.constant 0 : index
    %c0_3 = arith.constant 0 : index
    %4 = vector.load %arg3[%c0_2, %c0_3] : memref<32x512xbf16, #tpu.memory_space<vmem>>, vector<32x512xbf16>
    %c0_4 = arith.constant 0 : index
    %c0_5 = arith.constant 0 : index
    %5 = vector.load %arg4[%c0_4, %c0_5] : memref<512x128xbf16, #tpu.memory_space<vmem>>, vector<512x128xbf16>
    %cst = arith.constant dense<0.000000e+00> : vector<32x128xf32>
    %6 = tpu.matmul %4, %5, %cst {dimension_numbers = #tpu.dot_dimension_numbers<[1], [0], [0], [1], [0, 0, 1, 1], [], []>} : vector<32x512xbf16>, vector<512x128xbf16>, vector<32x128xf32> -> vector<32x128xf32>
    %7 = arith.addf %3, %6 : vector<32x128xf32>
    %c0_6 = arith.constant 0 : index
    %c0_7 = arith.constant 0 : index
    %8 = vector.load %arg7[%c0_6, %c0_7] : memref<32x128xf32, #tpu.memory_space<vmem>>, vector<32x128xf32>
    tpu.vector_store %arg7[%c0_6, %c0_7], %7 {strides = array<i32>} : memref<32x128xf32, #tpu.memory_space<vmem>>, vector<32x128xf32>,
    %c0_i32_8 = arith.constant 0 : i32
    %9 = arith.cmpi eq, %arg2, %c0_i32_8 : i32
    %10 = arith.extui %9 : i1 to i32
    %c0_i32_9 = arith.constant 0 : i32
    %11 = arith.cmpi ne, %10, %c0_i32_9 : i32
    scf.if %11 {
      %c0_10 = arith.constant 0 : index
      %c0_11 = arith.constant 0 : index
      %12 = vector.load %arg7[%c0_10, %c0_11] : memref<32x128xf32, #tpu.memory_space<vmem>>, vector<32x128xf32>
      %c0_12 = arith.constant 0 : index
      %c0_13 = arith.constant 0 : index
      %13 = vector.load %arg5[%c0_12, %c0_13] : memref<1x128xf32, #tpu.memory_space<vmem>>, vector<1x128xf32>
      %14 = vector.broadcast %13 : vector<1x128xf32> to vector<32x128xf32>
      %15 = arith.addf %12, %14 : vector<32x128xf32>
      %cst_14 = arith.constant 0.000000e+00 : f32
      %16 = vector.broadcast %cst_14 : f32 to vector<32x128xf32>
      %17 = arith.maximumf %15, %16 : vector<32x128xf32>
      %18 = arith.truncf %17 : vector<32x128xf32> to vector<32x128xbf16>
      %c0_15 = arith.constant 0 : index
      %c0_16 = arith.constant 0 : index
      %19 = vector.load %arg6[%c0_15, %c0_16] : memref<32x128xbf16, #tpu.memory_space<vmem>>, vector<32x128xbf16>
      tpu.vector_store %arg6[%c0_15, %c0_16], %18 {strides = array<i32>} : memref<32x128xbf16, #tpu.memory_space<vmem>>, vector<32x128xbf16>,
    } else {
    }
    return
  }
  func.func @transform_0(%arg0: i32, %arg1: i32, %arg2: i32) -> (i32, i32) {
    %c0_i32 = arith.constant 0 : i32
    return %arg0, %arg2 : i32, i32
  }
  func.func @transform_1(%arg0: i32, %arg1: i32, %arg2: i32) -> (i32, i32) {
    %c0_i32 = arith.constant 0 : i32
    return %arg2, %arg1 : i32, i32
  }
  func.func @transform_2(%arg0: i32, %arg1: i32, %arg2: i32) -> (i32, i32) {
    %c0_i32 = arith.constant 0 : i32
    %c0_i32_0 = arith.constant 0 : i32
    return %c0_i32, %arg1 : i32, i32
  }
  func.func @transform_3(%arg0: i32, %arg1: i32, %arg2: i32) -> (i32, i32) {
    %c0_i32 = arith.constant 0 : i32
    return %arg0, %arg1 : i32, i32
  }
}

module attributes {stable_mosaic.version = 11 : i64} {
  func.func @_conv3_fc_kernel(%arg0: i32, %arg1: memref<16x2304xbf16, #tpu.memory_space<vmem>>, %arg2: memref<2304x256xbf16, #tpu.memory_space<vmem>>, %arg3: memref<1x256xf32, #tpu.memory_space<vmem>>, %arg4: memref<256x512xbf16, #tpu.memory_space<vmem>>, %arg5: memref<1x512xf32, #tpu.memory_space<vmem>>, %arg6: memref<512x128xbf16, #tpu.memory_space<vmem>>, %arg7: memref<1x128xf32, #tpu.memory_space<vmem>>, %arg8: memref<16x128xf32, #tpu.memory_space<vmem>>) attributes {dimension_semantics = [#tpu.dimension_semantics<parallel>], iteration_bounds = array<i64: 1>, scalar_prefetch = 0 : i64, scratch_operands = 0 : i64, tpu.core_type = #tpu.core_type<tc>, window_params = [{transform_indices = @transform_0, window_bounds = array<i64: 16, 2304>}, {pipeline_mode = #tpu.pipeline_mode<synchronous>, transform_indices = @transform_1, window_bounds = array<i64: 2304, 256>}, {pipeline_mode = #tpu.pipeline_mode<synchronous>, transform_indices = @transform_2, window_bounds = array<i64: 1, 256>}, {pipeline_mode = #tpu.pipeline_mode<synchronous>, transform_indices = @transform_3, window_bounds = array<i64: 256, 512>}, {pipeline_mode = #tpu.pipeline_mode<synchronous>, transform_indices = @transform_4, window_bounds = array<i64: 1, 512>}, {pipeline_mode = #tpu.pipeline_mode<synchronous>, transform_indices = @transform_5, window_bounds = array<i64: 512, 128>}, {pipeline_mode = #tpu.pipeline_mode<synchronous>, transform_indices = @transform_6, window_bounds = array<i64: 1, 128>}, {transform_indices = @transform_7, window_bounds = array<i64: 16, 128>}]} {
    %c0 = arith.constant 0 : index
    %c0_0 = arith.constant 0 : index
    %0 = vector.load %arg1[%c0, %c0_0] : memref<16x2304xbf16, #tpu.memory_space<vmem>>, vector<16x2304xbf16>
    %c0_1 = arith.constant 0 : index
    %c0_2 = arith.constant 0 : index
    %1 = vector.load %arg2[%c0_1, %c0_2] : memref<2304x256xbf16, #tpu.memory_space<vmem>>, vector<2304x256xbf16>
    %cst = arith.constant dense<0.000000e+00> : vector<16x256xf32>
    %2 = tpu.matmul %0, %1, %cst {dimension_numbers = #tpu.dot_dimension_numbers<[1], [0], [0], [1], [0, 0, 1, 1], [], []>} : vector<16x2304xbf16>, vector<2304x256xbf16>, vector<16x256xf32> -> vector<16x256xf32>
    %c0_3 = arith.constant 0 : index
    %c0_4 = arith.constant 0 : index
    %3 = vector.load %arg3[%c0_3, %c0_4] : memref<1x256xf32, #tpu.memory_space<vmem>>, vector<1x256xf32>
    %4 = vector.broadcast %3 : vector<1x256xf32> to vector<16x256xf32>
    %5 = arith.addf %2, %4 : vector<16x256xf32>
    %cst_5 = arith.constant 0.000000e+00 : f32
    %6 = vector.broadcast %cst_5 : f32 to vector<16x256xf32>
    %7 = arith.maximumf %5, %6 : vector<16x256xf32>
    %8 = arith.truncf %7 : vector<16x256xf32> to vector<16x256xbf16>
    %c0_6 = arith.constant 0 : index
    %c0_7 = arith.constant 0 : index
    %9 = vector.load %arg4[%c0_6, %c0_7] : memref<256x512xbf16, #tpu.memory_space<vmem>>, vector<256x512xbf16>
    %cst_8 = arith.constant dense<0.000000e+00> : vector<16x512xf32>
    %10 = tpu.matmul %8, %9, %cst_8 {dimension_numbers = #tpu.dot_dimension_numbers<[1], [0], [0], [1], [0, 0, 1, 1], [], []>} : vector<16x256xbf16>, vector<256x512xbf16>, vector<16x512xf32> -> vector<16x512xf32>
    %c0_9 = arith.constant 0 : index
    %c0_10 = arith.constant 0 : index
    %11 = vector.load %arg5[%c0_9, %c0_10] : memref<1x512xf32, #tpu.memory_space<vmem>>, vector<1x512xf32>
    %12 = vector.broadcast %11 : vector<1x512xf32> to vector<16x512xf32>
    %13 = arith.addf %10, %12 : vector<16x512xf32>
    %cst_11 = arith.constant 0.000000e+00 : f32
    %14 = vector.broadcast %cst_11 : f32 to vector<16x512xf32>
    %15 = arith.maximumf %13, %14 : vector<16x512xf32>
    %16 = arith.truncf %15 : vector<16x512xf32> to vector<16x512xbf16>
    %c0_12 = arith.constant 0 : index
    %c0_13 = arith.constant 0 : index
    %17 = vector.load %arg6[%c0_12, %c0_13] : memref<512x128xbf16, #tpu.memory_space<vmem>>, vector<512x128xbf16>
    %cst_14 = arith.constant dense<0.000000e+00> : vector<16x128xf32>
    %18 = tpu.matmul %16, %17, %cst_14 {dimension_numbers = #tpu.dot_dimension_numbers<[1], [0], [0], [1], [0, 0, 1, 1], [], []>} : vector<16x512xbf16>, vector<512x128xbf16>, vector<16x128xf32> -> vector<16x128xf32>
    %c0_15 = arith.constant 0 : index
    %c0_16 = arith.constant 0 : index
    %19 = vector.load %arg7[%c0_15, %c0_16] : memref<1x128xf32, #tpu.memory_space<vmem>>, vector<1x128xf32>
    %20 = vector.broadcast %19 : vector<1x128xf32> to vector<16x128xf32>
    %21 = arith.addf %18, %20 : vector<16x128xf32>
    %c0_17 = arith.constant 0 : index
    %c0_18 = arith.constant 0 : index
    %22 = vector.load %arg8[%c0_17, %c0_18] : memref<16x128xf32, #tpu.memory_space<vmem>>, vector<16x128xf32>
    tpu.vector_store %arg8[%c0_17, %c0_18], %21 {strides = array<i32>} : memref<16x128xf32, #tpu.memory_space<vmem>>, vector<16x128xf32>,
    return
  }
  func.func @transform_0(%arg0: i32) -> (i32, i32) {
    %c0_i32 = arith.constant 0 : i32
    %c0_i32_0 = arith.constant 0 : i32
    return %arg0, %c0_i32 : i32, i32
  }
  func.func @transform_1(%arg0: i32) -> (i32, i32) {
    %c0_i32 = arith.constant 0 : i32
    %c0_i32_0 = arith.constant 0 : i32
    %c0_i32_1 = arith.constant 0 : i32
    return %c0_i32, %c0_i32_0 : i32, i32
  }
  func.func @transform_2(%arg0: i32) -> (i32, i32) {
    %c0_i32 = arith.constant 0 : i32
    %c0_i32_0 = arith.constant 0 : i32
    %c0_i32_1 = arith.constant 0 : i32
    return %c0_i32, %c0_i32_0 : i32, i32
  }
  func.func @transform_3(%arg0: i32) -> (i32, i32) {
    %c0_i32 = arith.constant 0 : i32
    %c0_i32_0 = arith.constant 0 : i32
    %c0_i32_1 = arith.constant 0 : i32
    return %c0_i32, %c0_i32_0 : i32, i32
  }
  func.func @transform_4(%arg0: i32) -> (i32, i32) {
    %c0_i32 = arith.constant 0 : i32
    %c0_i32_0 = arith.constant 0 : i32
    %c0_i32_1 = arith.constant 0 : i32
    return %c0_i32, %c0_i32_0 : i32, i32
  }
  func.func @transform_5(%arg0: i32) -> (i32, i32) {
    %c0_i32 = arith.constant 0 : i32
    %c0_i32_0 = arith.constant 0 : i32
    %c0_i32_1 = arith.constant 0 : i32
    return %c0_i32, %c0_i32_0 : i32, i32
  }
  func.func @transform_6(%arg0: i32) -> (i32, i32) {
    %c0_i32 = arith.constant 0 : i32
    %c0_i32_0 = arith.constant 0 : i32
    %c0_i32_1 = arith.constant 0 : i32
    return %c0_i32, %c0_i32_0 : i32, i32
  }
  func.func @transform_7(%arg0: i32) -> (i32, i32) {
    %c0_i32 = arith.constant 0 : i32
    %c0_i32_0 = arith.constant 0 : i32
    return %arg0, %c0_i32 : i32, i32
  }
}

</mosaic_0001>

<bundles_post_ra>
// kernel: dqn_forward.3
= control target key start
LH: loop header
LB: loop body
LE: loop exit
PB: predicated region body
PF: predicated region fallthrough
CT: control target
= control target key end

     0   :  { %s1319_s1 = inlined_call_operand.vmem [shape: bf16[256,128], index: 1, kind: input, shape index: {}]   ;;  %s1320_s0 = inlined_call_operand.vmem [shape: bf16[208,256], index: 0, kind: input, shape index: {}]   ;;  %s1321_s2 = inlined_call_operand.vmem [shape: f32[1,128], index: 2, kind: input, shape index: {}]   ;;  %s1322_s3 = inlined_call_operand.vmem [shape: bf16[208,128], index: 3, kind: output, shape index: {}]  }
   0x1   :  { %v1048_v0 = vld [vmem:[%s1319_s1 + $0x40] sm:$0xff]   ;;  %v1050_v2 = vld [vmem:[%s1319_s1 + $0x48] sm:$0xff]   ;;  %v1052_v4 = vld [vmem:[%s1319_s1 + $0x50] sm:$0xff]  }
   0x2   :  { %v1049_v1 = vld [vmem:[%s1319_s1] sm:$0xff]   ;;  %938 = vmatprep.subr.bf16.mxu0 %v1048_v0  ;;  %1032 = vmatprep.subr.bf16.mxu1 %v1048_v0  ;;  %v1051_v3 = vld [vmem:[%s1319_s1 + $0x8] sm:$0xff]   ;;  %v1053_v5 = vld [vmem:[%s1319_s1 + $0x10] sm:$0xff]  }
   0x3   :  { %939 = vmatpush3.bf16.msra.mxu0 %v1049_v1  ;;  %1040 = vmatpush3.bf16.msra.mxu1 %v1049_v1  ;;  %v1054_v6 = vld [vmem:[%s1319_s1 + $0x58] sm:$0xff]   ;;  %v1056_v8 = vld [vmem:[%s1319_s1 + $0x60] sm:$0xff]   ;;  %v1058_v10 = vld [vmem:[%s1319_s1 + $0x68] sm:$0xff]  }
   0x4   :  { %940 = vmatprep.subr.bf16.mxu0 %v1050_v2  ;;  %1033 = vmatprep.subr.bf16.mxu1 %v1050_v2  ;;  %v1055_v7 = vld [vmem:[%s1319_s1 + $0x18] sm:$0xff]   ;;  %v1057_v9 = vld [vmem:[%s1319_s1 + $0x20] sm:$0xff]   ;;  %v1059_v13 = vld [vmem:[%s1319_s1 + $0x28] sm:$0xff]  }
   0x5   :  { %v1066_v11 = vld [vmem:[%s1320_s0 + $0x4] ss:$8 sps:$4 sm:$0xff]   ;;  %v1069_v12 = vld [vmem:[%s1320_s0 + $0x74] ss:$8 sps:$4 sm:$0xff]   ;;  %v1064_v18 = vld [vmem:[%s1320_s0] ss:$8 sps:$4 sm:$0xff]  }
   0x6   :  { %v1060_v14 = vld [vmem:[%s1319_s1 + $0x70] sm:$0xff]   ;;  %387 = vmatprep.mubr.bf16.mxu0 %v1066_v11  ;;  %443 = vmatprep.mubr.bf16.mxu1 %v1069_v12  ;;  %v1062_v16 = vld [vmem:[%s1319_s1 + $0x78] sm:$0xff]   ;;  %v1073_v21 = vld [vmem:[%s1320_s0 + $0x84] ss:$8 sps:$4 sm:$0xff]  }
   0x7   :  { %941 = vmatpush3.bf16.msra.mxu0 %v1051_v3  ;;  %1041 = vmatpush3.bf16.msra.mxu1 %v1051_v3  ;;  %v1061_v15 = vld [vmem:[%s1319_s1 + $0x30] sm:$0xff]   ;;  %v1063_v17 = vld [vmem:[%s1319_s1 + $0x38] sm:$0xff]   ;;  %v1075_v23 = vld [vmem:[%s1320_s0 + $0x80] ss:$8 sps:$4 sm:$0xff]  }
   0x8   :  { %942 = vmatprep.subr.bf16.mxu0 %v1052_v4  ;;  %1034 = vmatprep.subr.bf16.mxu1 %v1052_v4  ;;  %v1067_v19 = vld [vmem:[%s1320_s0 + $0x70] ss:$8 sps:$4 sm:$0xff]   ;;  %v1070_v20 = vld [vmem:[%s1320_s0 + $0x14] ss:$8 sps:$4 sm:$0xff]   ;;  %v1076_v24 = vld [vmem:[%s1320_s0 + $0x24] ss:$8 sps:$4 sm:$0xff]  }
   0x9   :  { %v1072_v22 = vld [vmem:[%s1320_s0 + $0x10] ss:$8 sps:$4 sm:$0xff]   ;;  %v1079_v25 = vld [vmem:[%s1320_s0 + $0x94] ss:$8 sps:$4 sm:$0xff]   ;;  %v1078_v26 = vld [vmem:[%s1320_s0 + $0x20] ss:$8 sps:$4 sm:$0xff]  }
   0xa   :  { %v1081_v27 = vld [vmem:[%s1320_s0 + $0x90] ss:$8 sps:$4 sm:$0xff]   ;;  %v1082_v28 = vld [vmem:[%s1320_s0 + $0x34] ss:$8 sps:$4 sm:$0xff]   ;;  %v1085_v29 = vld [vmem:[%s1320_s0 + $0xa4] ss:$8 sps:$4 sm:$0xff]  }
   0xb   :  { %943 = vmatpush3.bf16.msra.mxu0 %v1053_v5  ;;  %1042 = vmatpush3.bf16.msra.mxu1 %v1053_v5  ;;  %v1084_v30 = vld [vmem:[%s1320_s0 + $0x30] ss:$8 sps:$4 sm:$0xff]   ;;  %v1087_v31 = vld [vmem:[%s1320_s0 + $0xa0] ss:$8 sps:$4 sm:$0xff]   ;;  %v1088_v32 = vld [vmem:[%s1320_s0 + $0x44] ss:$8 sps:$4 sm:$0xff]  }
   0xc   :  { %944 = vmatprep.subr.bf16.mxu0 %v1054_v6  ;;  %1035 = vmatprep.subr.bf16.mxu1 %v1054_v6  ;;  %v1091_v33 = vld [vmem:[%s1320_s0 + $0xb4] ss:$8 sps:$4 sm:$0xff]   ;;  %v1090_v34 = vld [vmem:[%s1320_s0 + $0x40] ss:$8 sps:$4 sm:$0xff]   ;;  %v1093_v35 = vld [vmem:[%s1320_s0 + $0xb0] ss:$8 sps:$4 sm:$0xff]  }
   0xd   :  { %v1094_v36 = vld [vmem:[%s1320_s0 + $0x54] ss:$8 sps:$4 sm:$0xff]   ;;  %v1097_v37 = vld [vmem:[%s1320_s0 + $0xc4] ss:$8 sps:$4 sm:$0xff]   ;;  %v1096_v38 = vld [vmem:[%s1320_s0 + $0x50] ss:$8 sps:$4 sm:$0xff]  }
   0xe   :  { %v1099_v39 = vld [vmem:[%s1320_s0 + $0xc0] ss:$8 sps:$4 sm:$0xff]   ;;  %v1100_v40 = vld [vmem:[%s1320_s0 + $0x64] ss:$8 sps:$4 sm:$0xff]  }
   0xf   :  { %945 = vmatpush3.bf16.msra.mxu0 %v1055_v7  ;;  %1043 = vmatpush3.bf16.msra.mxu1 %v1055_v7  ;;  %v1102_v41 = vld [vmem:[%s1320_s0 + $0x60] ss:$8 sps:$4 sm:$0xff]  }
  0x10   :  { %946 = vmatprep.subr.bf16.mxu0 %v1056_v8  ;;  %1036 = vmatprep.subr.bf16.mxu1 %v1056_v8  ;;  %v1252_v45 = vld [vmem:[%s1321_s2] ss:$0 sm:$0xff] }
  0x13   :  { %947 = vmatpush3.bf16.msra.mxu0 %v1057_v9  ;;  %1044 = vmatpush3.bf16.msra.mxu1 %v1057_v9 }
  0x14   :  { %948 = vmatprep.subr.bf16.mxu0 %v1058_v10  ;;  %1037 = vmatprep.subr.bf16.mxu1 %v1058_v10 }
  0x17   :  { %949 = vmatpush3.bf16.msra.mxu0 %v1059_v13  ;;  %1045 = vmatpush3.bf16.msra.mxu1 %v1059_v13 }
  0x18   :  { %950 = vmatprep.subr.bf16.mxu0 %v1060_v14  ;;  %1038 = vmatprep.subr.bf16.mxu1 %v1060_v14 }
  0x1b   :  { %951 = vmatpush3.bf16.msra.mxu0 %v1061_v15  ;;  %1046 = vmatpush3.bf16.msra.mxu1 %v1061_v15 }
  0x1c   :  { %952 = vmatprep.subr.bf16.mxu0 %v1062_v16  ;;  %1039 = vmatprep.subr.bf16.mxu1 %v1062_v16 }
  0x1f   :  { %953 = vmatpush3.bf16.msra.mxu0 %v1063_v17  ;;  %1047 = vmatpush3.bf16.msra.mxu1 %v1063_v17 }
  0x22   :  { %388 = vmatmul.mubr.bf16.vlgmr.msra.gmra.mrb[0].mxu0 %v1064_v18  ;;  %444 = vmatmul.mubr.bf16.vlgmr.msra.gmra.mrb[0].mxu1 %v1067_v19 }
  0x23   :  { %395 = vmatprep.mubr.bf16.mxu0 %v1070_v20  ;;  %451 = vmatprep.mubr.bf16.mxu1 %v1073_v21 }
  0x2a   :  { %396 = vmatmul.mubr.bf16.gmra.mrb[4].mxu0 %v1072_v22  ;;  %452 = vmatmul.mubr.bf16.gmra.mrb[4].mxu1 %v1075_v23 }
  0x2b   :  { %403 = vmatprep.mubr.bf16.mxu0 %v1076_v24  ;;  %459 = vmatprep.mubr.bf16.mxu1 %v1079_v25 }
  0x32   :  { %404 = vmatmul.mubr.bf16.gmra.mrb[8].mxu0 %v1078_v26  ;;  %460 = vmatmul.mubr.bf16.gmra.mrb[8].mxu1 %v1081_v27 }
  0x33   :  { %411 = vmatprep.mubr.bf16.mxu0 %v1082_v28  ;;  %467 = vmatprep.mubr.bf16.mxu1 %v1085_v29 }
  0x3a   :  { %412 = vmatmul.mubr.bf16.gmra.mrb[12].mxu0 %v1084_v30  ;;  %468 = vmatmul.mubr.bf16.gmra.mrb[12].mxu1 %v1087_v31 }
  0x3b   :  { %419 = vmatprep.mubr.bf16.mxu0 %v1088_v32  ;;  %475 = vmatprep.mubr.bf16.mxu1 %v1091_v33 }
  0x42   :  { %420 = vmatmul.mubr.bf16.gmra.mrb[16].mxu0 %v1090_v34  ;;  %476 = vmatmul.mubr.bf16.gmra.mrb[16].mxu1 %v1093_v35 }
  0x43   :  { %427 = vmatprep.mubr.bf16.mxu0 %v1094_v36  ;;  %483 = vmatprep.mubr.bf16.mxu1 %v1097_v37 }
  0x4a   :  { %428 = vmatmul.mubr.bf16.gmra.mrb[20].mxu0 %v1096_v38  ;;  %484 = vmatmul.mubr.bf16.gmra.mrb[20].mxu1 %v1099_v39 }
  0x4b   :  { %435 = vmatprep.mubr.bf16.mxu0 %v1100_v40 }
  0x52   :  { %436 = vmatmul.mubr.bf16.gmra.mrb[24].mxu0 %v1102_v41 }
  0xf5   :  { %v954_v42 = vpop.f32.mrb[0].mxu0  ;;  %v996_v43 = vpop.f32.mrb[0].mxu1 }
  0xf6   :  { %v955_v44 = vpop.f32.mrb[1].mxu0  ;;  %v997_v46 = vpop.f32.mrb[1].mxu1 }
  0xf7   :  { %v956_v47 = vadd.f32 %v955_v44, %v954_v42  ;;  %v957_v48 = vpop.f32.mrb[2].mxu0  ;;  %v998_v49 = vadd.f32 %v997_v46, %v996_v43  ;;  %v999_v50 = vpop.f32.mrb[2].mxu1 }
  0xf8   :  { %v958_v51 = vpop.f32.mrb[3].mxu0  ;;  %v1000_v52 = vpop.f32.mrb[3].mxu1 }
  0xf9   :  { %v580_v53 = vadd.f32 %v956_v47, %v1252_v45  ;;  %v959_v54 = vadd.f32 %v958_v51, %v957_v48  ;;  %v594_v55 = vadd.f32 %v998_v49, %v1252_v45  ;;  %v1001_v56 = vadd.f32 %v1000_v52, %v999_v50 }
  0xfb   :  { %v581_v57 = vadd.f32 %v959_v54, %v1252_v45  ;;  %v620_v58 = vmax.f32 %v594_v55, 0.0  ;;  %v595_v59 = vadd.f32 %v1001_v56, %v1252_v45  ;;  %v606_v60 = vmax.f32 %v580_v53, 0.0 }
  0xfd   :  { %v607_v61 = vmax.f32 %v581_v57, 0.0  ;;  %v960_v62 = vpop.f32.mrb[4].mxu0  ;;  %v621_v63 = vmax.f32 %v595_v59, 0.0  ;;  %v1002_v0 = vpop.f32.mrb[4].mxu1 }
  0xfe   :  { %v961_v1 = vpop.f32.mrb[5].mxu0  ;;  %v1003_v2 = vpop.f32.mrb[5].mxu1 }
  0xff   :  { %v864_v3 = vpack.c.bf16 %v607_v61, %v606_v60  ;;  %v899_v4 = vpack.c.bf16 %v621_v63, %v620_v58  ;;  %v962_v5 = vadd.f32 %v961_v1, %v960_v62  ;;  %v963_v6 = vpop.f32.mrb[6].mxu0  ;;  %v1004_v7 = vadd.f32 %v1003_v2, %v1002_v0  ;;  %v1005_v8 = vpop.f32.mrb[6].mxu1 }
 0x100   :  { %v964_v9 = vpop.f32.mrb[7].mxu0  ;;  %v1006_v10 = vpop.f32.mrb[7].mxu1 }
 0x101   :  { %865 = vst [vmem:[%s1322_s3] sm:$0xff] %v864_v3   ;;  %932 = vst [vmem:[%s1322_s3 + $0x38] sm:$0xff] %v899_v4   ;;  %v582_v11 = vadd.f32 %v962_v5, %v1252_v45  ;;  %v965_v12 = vadd.f32 %v964_v9, %v963_v6  ;;  %v596_v13 = vadd.f32 %v1004_v7, %v1252_v45 }
 0x102   :  { %v1007_v14 = vadd.f32 %v1006_v10, %v1005_v8 }
 0x103   :  { %v583_v15 = vadd.f32 %v965_v12, %v1252_v45  ;;  %v622_v16 = vmax.f32 %v596_v13, 0.0  ;;  %v608_v18 = vmax.f32 %v582_v11, 0.0 }
 0x104   :  { %v597_v17 = vadd.f32 %v1007_v14, %v1252_v45 }
 0x105   :  { %v609_v19 = vmax.f32 %v583_v15, 0.0  ;;  %v966_v20 = vpop.f32.mrb[8].mxu0  ;;  %v1008_v22 = vpop.f32.mrb[8].mxu1 }
 0x106   :  { %v623_v21 = vmax.f32 %v597_v17, 0.0  ;;  %v967_v23 = vpop.f32.mrb[9].mxu0  ;;  %v1009_v24 = vpop.f32.mrb[9].mxu1 }
 0x107   :  { %v869_v25 = vpack.c.bf16 %v609_v19, %v608_v18  ;;  %v968_v27 = vadd.f32 %v967_v23, %v966_v20  ;;  %v969_v28 = vpop.f32.mrb[10].mxu0  ;;  %v1010_v29 = vadd.f32 %v1009_v24, %v1008_v22  ;;  %v1011_v30 = vpop.f32.mrb[10].mxu1 }
 0x108   :  { %v904_v26 = vpack.c.bf16 %v623_v21, %v622_v16  ;;  %v970_v31 = vpop.f32.mrb[11].mxu0  ;;  %v1012_v32 = vpop.f32.mrb[11].mxu1 }
 0x109   :  { %926 = vst [vmem:[%s1322_s3 + $0x8] sm:$0xff] %v869_v25   ;;  %v584_v33 = vadd.f32 %v968_v27, %v1252_v45  ;;  %v971_v34 = vadd.f32 %v970_v31, %v969_v28  ;;  %v598_v35 = vadd.f32 %v1010_v29, %v1252_v45  ;;  %v1013_v36 = vadd.f32 %v1012_v32, %v1011_v30 }
 0x10a   :  { %933 = vst [vmem:[%s1322_s3 + $0x40] sm:$0xff] %v904_v26  }
 0x10b   :  { %v585_v37 = vadd.f32 %v971_v34, %v1252_v45  ;;  %v624_v38 = vmax.f32 %v598_v35, 0.0  ;;  %v599_v39 = vadd.f32 %v1013_v36, %v1252_v45  ;;  %v610_v40 = vmax.f32 %v584_v33, 0.0 }
 0x10d   :  { %v611_v41 = vmax.f32 %v585_v37, 0.0  ;;  %v972_v42 = vpop.f32.mrb[12].mxu0  ;;  %v625_v43 = vmax.f32 %v599_v39, 0.0  ;;  %v1014_v44 = vpop.f32.mrb[12].mxu1 }
 0x10e   :  { %v973_v46 = vpop.f32.mrb[13].mxu0  ;;  %v1015_v47 = vpop.f32.mrb[13].mxu1 }
 0x10f   :  { %v874_v48 = vpack.c.bf16 %v611_v41, %v610_v40  ;;  %v909_v49 = vpack.c.bf16 %v625_v43, %v624_v38  ;;  %v974_v50 = vadd.f32 %v973_v46, %v972_v42  ;;  %v975_v51 = vpop.f32.mrb[14].mxu0  ;;  %v1016_v52 = vadd.f32 %v1015_v47, %v1014_v44  ;;  %v1017_v53 = vpop.f32.mrb[14].mxu1 }
 0x110   :  { %v976_v54 = vpop.f32.mrb[15].mxu0  ;;  %v1018_v55 = vpop.f32.mrb[15].mxu1 }
 0x111   :  { %927 = vst [vmem:[%s1322_s3 + $0x10] sm:$0xff] %v874_v48   ;;  %934 = vst [vmem:[%s1322_s3 + $0x48] sm:$0xff] %v909_v49   ;;  %v586_v56 = vadd.f32 %v974_v50, %v1252_v45  ;;  %v977_v57 = vadd.f32 %v976_v54, %v975_v51  ;;  %v600_v58 = vadd.f32 %v1016_v52, %v1252_v45 }
 0x112   :  { %v1019_v59 = vadd.f32 %v1018_v55, %v1017_v53 }
 0x113   :  { %v587_v60 = vadd.f32 %v977_v57, %v1252_v45  ;;  %v626_v61 = vmax.f32 %v600_v58, 0.0  ;;  %v612_v63 = vmax.f32 %v586_v56, 0.0 }
 0x114   :  { %v601_v62 = vadd.f32 %v1019_v59, %v1252_v45 }
 0x115   :  { %v613_v0 = vmax.f32 %v587_v60, 0.0  ;;  %v978_v1 = vpop.f32.mrb[16].mxu0  ;;  %v1020_v3 = vpop.f32.mrb[16].mxu1 }
 0x116   :  { %v627_v2 = vmax.f32 %v601_v62, 0.0  ;;  %v979_v4 = vpop.f32.mrb[17].mxu0  ;;  %v1021_v5 = vpop.f32.mrb[17].mxu1 }
 0x117   :  { %v879_v6 = vpack.c.bf16 %v613_v0, %v612_v63  ;;  %v980_v8 = vadd.f32 %v979_v4, %v978_v1  ;;  %v981_v9 = vpop.f32.mrb[18].mxu0  ;;  %v1022_v10 = vadd.f32 %v1021_v5, %v1020_v3  ;;  %v1023_v11 = vpop.f32.mrb[18].mxu1 }
 0x118   :  { %v914_v7 = vpack.c.bf16 %v627_v2, %v626_v61  ;;  %v982_v12 = vpop.f32.mrb[19].mxu0  ;;  %v1024_v13 = vpop.f32.mrb[19].mxu1 }
 0x119   :  { %928 = vst [vmem:[%s1322_s3 + $0x18] sm:$0xff] %v879_v6   ;;  %v588_v14 = vadd.f32 %v980_v8, %v1252_v45  ;;  %v983_v15 = vadd.f32 %v982_v12, %v981_v9  ;;  %v602_v16 = vadd.f32 %v1022_v10, %v1252_v45  ;;  %v1025_v17 = vadd.f32 %v1024_v13, %v1023_v11 }
 0x11a   :  { %935 = vst [vmem:[%s1322_s3 + $0x50] sm:$0xff] %v914_v7  }
 0x11b   :  { %v589_v18 = vadd.f32 %v983_v15, %v1252_v45  ;;  %v628_v19 = vmax.f32 %v602_v16, 0.0  ;;  %v603_v20 = vadd.f32 %v1025_v17, %v1252_v45  ;;  %v614_v21 = vmax.f32 %v588_v14, 0.0 }
 0x11d   :  { %v615_v22 = vmax.f32 %v589_v18, 0.0  ;;  %v984_v23 = vpop.f32.mrb[20].mxu0  ;;  %v629_v24 = vmax.f32 %v603_v20, 0.0  ;;  %v1026_v25 = vpop.f32.mrb[20].mxu1 }
 0x11e   :  { %v985_v26 = vpop.f32.mrb[21].mxu0  ;;  %v1027_v27 = vpop.f32.mrb[21].mxu1 }
 0x11f   :  { %v884_v28 = vpack.c.bf16 %v615_v22, %v614_v21  ;;  %v919_v29 = vpack.c.bf16 %v629_v24, %v628_v19  ;;  %v986_v30 = vadd.f32 %v985_v26, %v984_v23  ;;  %v987_v31 = vpop.f32.mrb[22].mxu0  ;;  %v1028_v32 = vadd.f32 %v1027_v27, %v1026_v25  ;;  %v1029_v33 = vpop.f32.mrb[22].mxu1 }
 0x120   :  { %v988_v34 = vpop.f32.mrb[23].mxu0  ;;  %v1030_v35 = vpop.f32.mrb[23].mxu1 }
 0x121   :  { %929 = vst [vmem:[%s1322_s3 + $0x20] sm:$0xff] %v884_v28   ;;  %936 = vst [vmem:[%s1322_s3 + $0x58] sm:$0xff] %v919_v29   ;;  %v590_v36 = vadd.f32 %v986_v30, %v1252_v45  ;;  %v989_v37 = vadd.f32 %v988_v34, %v987_v31  ;;  %v604_v38 = vadd.f32 %v1028_v32, %v1252_v45 }
 0x122   :  { %v1031_v39 = vadd.f32 %v1030_v35, %v1029_v33 }
 0x123   :  { %v591_v40 = vadd.f32 %v989_v37, %v1252_v45  ;;  %v630_v41 = vmax.f32 %v604_v38, 0.0  ;;  %v616_v43 = vmax.f32 %v590_v36, 0.0 }
 0x124   :  { %v605_v42 = vadd.f32 %v1031_v39, %v1252_v45 }
 0x125   :  { %v617_v44 = vmax.f32 %v591_v40, 0.0  ;;  %v990_v46 = vpop.f32.mrb[24].mxu0 }
 0x126   :  { %v631_v47 = vmax.f32 %v605_v42, 0.0  ;;  %v991_v48 = vpop.f32.mrb[25].mxu0 }
 0x127   :  { %v889_v49 = vpack.c.bf16 %v617_v44, %v616_v43  ;;  %v992_v51 = vadd.f32 %v991_v48, %v990_v46  ;;  %v993_v52 = vpop.f32.mrb[26].mxu0 }
 0x128   :  { %v924_v50 = vpack.c.bf16 %v631_v47, %v630_v41  ;;  %v994_v53 = vpop.f32.mrb[27].mxu0 }
 0x129   :  { %930 = vst [vmem:[%s1322_s3 + $0x28] sm:$0xff] %v889_v49   ;;  %v592_v54 = vadd.f32 %v992_v51, %v1252_v45  ;;  %v995_v55 = vadd.f32 %v994_v53, %v993_v52 }
 0x12a   :  { %937 = vst [vmem:[%s1322_s3 + $0x60] sm:$0xff] %v924_v50  }
 0x12b   :  { %v593_v56 = vadd.f32 %v995_v55, %v1252_v45  ;;  %v618_v57 = vmax.f32 %v592_v54, 0.0 }
 0x12d   :  { %v619_v58 = vmax.f32 %v593_v56, 0.0 }
 0x12f   :  { %v894_v59 = vpack.c.bf16 %v619_v58, %v618_v57 }
 0x131   :  { %931 = vst [vmem:[%s1322_s3 + $0x30] sm:$0xff] %v894_v59  }

// kernel: dqn_forward.4
= control target key start
LH: loop header
LB: loop body
LE: loop exit
PB: predicated region body
PF: predicated region fallthrough
CT: control target
= control target key end

     0   :  { %s792_s1 = inlined_call_operand.vmem [shape: bf16[512,128], index: 1, kind: input, shape index: {}]   ;;  %s793_s0 = inlined_call_operand.vmem [shape: bf16[32,512], index: 0, kind: input, shape index: {}]   ;;  %s794_s2 = inlined_call_operand.vmem [shape: f32[1,128], index: 2, kind: input, shape index: {}]   ;;  %s795_s3 = inlined_call_operand.vmem [shape: bf16[32,128], index: 3, kind: output, shape index: {}]  }
   0x1   :  { %v599_v0 = vld [vmem:[%s792_s1 + $0x40] sm:$0xff]   ;;  %v603_v4 = vld [vmem:[%s792_s1 + $0x48] sm:$0xff]   ;;  %v607_v8 = vld [vmem:[%s792_s1 + $0x50] sm:$0xff]  }
   0x2   :  { %v600_v1 = vld [vmem:[%s792_s1 + $0xc0] sm:$0xff]   ;;  %543 = vmatprep.subr.bf16.mxu0 %v599_v0  ;;  %v604_v5 = vld [vmem:[%s792_s1 + $0xc8] sm:$0xff]   ;;  %v608_v9 = vld [vmem:[%s792_s1 + $0xd0] sm:$0xff]  }
   0x3   :  { %v601_v2 = vld [vmem:[%s792_s1] sm:$0xff]   ;;  %571 = vmatprep.subr.bf16.mxu1 %v600_v1  ;;  %v605_v6 = vld [vmem:[%s792_s1 + $0x8] sm:$0xff]   ;;  %v609_v10 = vld [vmem:[%s792_s1 + $0x10] sm:$0xff]  }
   0x4   :  { %v602_v3 = vld [vmem:[%s792_s1 + $0x80] sm:$0xff]   ;;  %544 = vmatpush3.bf16.msra.mxu0 %v601_v2  ;;  %v606_v7 = vld [vmem:[%s792_s1 + $0x88] sm:$0xff]   ;;  %v610_v11 = vld [vmem:[%s792_s1 + $0x90] sm:$0xff]  }
   0x5   :  { %572 = vmatpush3.bf16.msra.mxu1 %v602_v3  ;;  %545 = vmatprep.subr.bf16.mxu0 %v603_v4  ;;  %v611_v12 = vld [vmem:[%s792_s1 + $0x58] sm:$0xff]   ;;  %v615_v16 = vld [vmem:[%s792_s1 + $0x60] sm:$0xff]   ;;  %v619_v20 = vld [vmem:[%s792_s1 + $0x68] sm:$0xff]  }
   0x6   :  { %573 = vmatprep.subr.bf16.mxu1 %v604_v5  ;;  %v612_v13 = vld [vmem:[%s792_s1 + $0xd8] sm:$0xff]   ;;  %v616_v17 = vld [vmem:[%s792_s1 + $0xe0] sm:$0xff]   ;;  %v620_v21 = vld [vmem:[%s792_s1 + $0xe8] sm:$0xff]  }
   0x7   :  { %v613_v14 = vld [vmem:[%s792_s1 + $0x18] sm:$0xff]   ;;  %v617_v18 = vld [vmem:[%s792_s1 + $0x20] sm:$0xff]   ;;  %v621_v22 = vld [vmem:[%s792_s1 + $0x28] sm:$0xff]  }
   0x8   :  { %546 = vmatpush3.bf16.msra.mxu0 %v605_v6  ;;  %v614_v15 = vld [vmem:[%s792_s1 + $0x98] sm:$0xff]   ;;  %v618_v19 = vld [vmem:[%s792_s1 + $0xa0] sm:$0xff]   ;;  %v622_v23 = vld [vmem:[%s792_s1 + $0xa8] sm:$0xff]  }
   0x9   :  { %574 = vmatpush3.bf16.msra.mxu1 %v606_v7  ;;  %547 = vmatprep.subr.bf16.mxu0 %v607_v8  ;;  %v623_v24 = vld [vmem:[%s792_s1 + $0x70] sm:$0xff]   ;;  %v627_v28 = vld [vmem:[%s792_s1 + $0x78] sm:$0xff]   ;;  %v523_v49 = vld [vmem:[%s794_s2] ss:$0 sm:$0xff] }
   0xa   :  { %575 = vmatprep.subr.bf16.mxu1 %v608_v9  ;;  %v624_v25 = vld [vmem:[%s792_s1 + $0xf0] sm:$0xff]   ;;  %v628_v29 = vld [vmem:[%s792_s1 + $0xf8] sm:$0xff]  }
   0xb   :  { %v625_v26 = vld [vmem:[%s792_s1 + $0x30] sm:$0xff]   ;;  %v629_v30 = vld [vmem:[%s792_s1 + $0x38] sm:$0xff]  }
   0xc   :  { %548 = vmatpush3.bf16.msra.mxu0 %v609_v10  ;;  %v626_v27 = vld [vmem:[%s792_s1 + $0xb0] sm:$0xff]   ;;  %v630_v31 = vld [vmem:[%s792_s1 + $0xb8] sm:$0xff]  }
   0xd   :  { %576 = vmatpush3.bf16.msra.mxu1 %v610_v11  ;;  %549 = vmatprep.subr.bf16.mxu0 %v611_v12  ;;  %v631_v32 = vld [vmem:[%s793_s0] ss:$16 sps:$4 sm:$0xff]   ;;  %v633_v33 = vld [vmem:[%s793_s0 + $0x4] ss:$16 sps:$4 sm:$0xff]   ;;  %v634_v34 = vld [vmem:[%s793_s0 + $0x8] ss:$16 sps:$4 sm:$0xff]  }
   0xe   :  { %577 = vmatprep.subr.bf16.mxu1 %v612_v13  ;;  %v636_v35 = vld [vmem:[%s793_s0 + $0xc] ss:$16 sps:$4 sm:$0xff]   ;;  %363 = vmatprep.mubr.bf16.mxu0 %v633_v33  ;;  %v637_v36 = vld [vmem:[%s793_s0 + $0x24] ss:$16 sps:$4 sm:$0xff]   ;;  %v641_v38 = vld [vmem:[%s793_s0 + $0x20] ss:$16 sps:$4 sm:$0xff]  }
   0xf   :  { %412 = vmatprep.mubr.bf16.mxu1 %v636_v35  ;;  %v639_v37 = vld [vmem:[%s793_s0 + $0x2c] ss:$16 sps:$4 sm:$0xff]   ;;  %v642_v39 = vld [vmem:[%s793_s0 + $0x28] ss:$16 sps:$4 sm:$0xff]  }
  0x10   :  { %550 = vmatpush3.bf16.msra.mxu0 %v613_v14 }
  0x11   :  { %578 = vmatpush3.bf16.msra.mxu1 %v614_v15  ;;  %551 = vmatprep.subr.bf16.mxu0 %v615_v16 }
  0x12   :  { %579 = vmatprep.subr.bf16.mxu1 %v616_v17 }
  0x14   :  { %552 = vmatpush3.bf16.msra.mxu0 %v617_v18 }
  0x15   :  { %580 = vmatpush3.bf16.msra.mxu1 %v618_v19  ;;  %553 = vmatprep.subr.bf16.mxu0 %v619_v20 }
  0x16   :  { %581 = vmatprep.subr.bf16.mxu1 %v620_v21 }
  0x18   :  { %554 = vmatpush3.bf16.msra.mxu0 %v621_v22 }
  0x19   :  { %582 = vmatpush3.bf16.msra.mxu1 %v622_v23  ;;  %555 = vmatprep.subr.bf16.mxu0 %v623_v24 }
  0x1a   :  { %583 = vmatprep.subr.bf16.mxu1 %v624_v25 }
  0x1c   :  { %556 = vmatpush3.bf16.msra.mxu0 %v625_v26 }
  0x1d   :  { %584 = vmatpush3.bf16.msra.mxu1 %v626_v27  ;;  %557 = vmatprep.subr.bf16.mxu0 %v627_v28 }
  0x1e   :  { %585 = vmatprep.subr.bf16.mxu1 %v628_v29 }
  0x20   :  { %558 = vmatpush3.bf16.msra.mxu0 %v629_v30 }
  0x21   :  { %586 = vmatpush3.bf16.msra.mxu1 %v630_v31 }
  0x23   :  { %364 = vmatmul.mubr.bf16.vlgmr.msra.gmra.mrb[0].mxu0 %v631_v32 }
  0x24   :  { %413 = vmatmul.mubr.bf16.vlgmr.msra.gmra.mrb[0].mxu1 %v634_v34  ;;  %371 = vmatprep.mubr.bf16.mxu0 %v637_v36 }
  0x25   :  { %420 = vmatprep.mubr.bf16.mxu1 %v639_v37 }
  0x2b   :  { %372 = vmatmul.mubr.bf16.gmra.mrb[4].mxu0 %v641_v38 }
  0x2c   :  { %421 = vmatmul.mubr.bf16.gmra.mrb[4].mxu1 %v642_v39 }
  0xf6   :  { %v559_v40 = vpop.f32.mrb[0].mxu0 }
  0xf7   :  { %v587_v41 = vpop.f32.mrb[0].mxu1  ;;  %v560_v42 = vpop.f32.mrb[1].mxu0 }
  0xf8   :  { %v561_v43 = vadd.f32 %v560_v42, %v559_v40  ;;  %v588_v44 = vpop.f32.mrb[1].mxu1  ;;  %v562_v45 = vpop.f32.mrb[2].mxu0 }
  0xf9   :  { %v589_v46 = vadd.f32 %v588_v44, %v587_v41  ;;  %v590_v47 = vpop.f32.mrb[2].mxu1  ;;  %v563_v48 = vpop.f32.mrb[3].mxu0 }
  0xfa   :  { %v564_v50 = vadd.f32 %v563_v48, %v562_v45  ;;  %v591_v51 = vpop.f32.mrb[3].mxu1 }
  0xfb   :  { %v415_v52 = vadd.f32 %v589_v46, %v561_v43  ;;  %v592_v53 = vadd.f32 %v591_v51, %v590_v47 }
  0xfd   :  { %v451_v54 = vadd.f32 %v523_v49, %v415_v52  ;;  %v418_v55 = vadd.f32 %v592_v53, %v564_v50 }
  0xfe   :  { %v565_v56 = vpop.f32.mrb[4].mxu0 }
  0xff   :  { %v452_v57 = vadd.f32 %v523_v49, %v418_v55  ;;  %v593_v58 = vpop.f32.mrb[4].mxu1  ;;  %v566_v59 = vpop.f32.mrb[5].mxu0  ;;  %v455_v63 = vmax.f32 %v451_v54, 0.0 }
 0x100   :  { %v567_v60 = vadd.f32 %v566_v59, %v565_v56  ;;  %v594_v61 = vpop.f32.mrb[5].mxu1  ;;  %v568_v62 = vpop.f32.mrb[6].mxu0 }
 0x101   :  { %v456_v0 = vmax.f32 %v452_v57, 0.0  ;;  %v595_v1 = vadd.f32 %v594_v61, %v593_v58  ;;  %v596_v2 = vpop.f32.mrb[6].mxu1  ;;  %v569_v3 = vpop.f32.mrb[7].mxu0 }
 0x102   :  { %v570_v4 = vadd.f32 %v569_v3, %v568_v62  ;;  %v597_v5 = vpop.f32.mrb[7].mxu1 }
 0x103   :  { %v535_v6 = vpack.c.bf16 %v456_v0, %v455_v63  ;;  %v423_v7 = vadd.f32 %v595_v1, %v567_v60  ;;  %v598_v8 = vadd.f32 %v597_v5, %v596_v2 }
 0x105   :  { %536 = vst [vmem:[%s795_s3] sm:$0xff] %v535_v6   ;;  %v453_v9 = vadd.f32 %v523_v49, %v423_v7  ;;  %v426_v10 = vadd.f32 %v598_v8, %v570_v4 }
 0x107   :  { %v454_v11 = vadd.f32 %v523_v49, %v426_v10  ;;  %v457_v12 = vmax.f32 %v453_v9, 0.0 }
 0x109   :  { %v458_v13 = vmax.f32 %v454_v11, 0.0 }
 0x10b   :  { %v540_v14 = vpack.c.bf16 %v458_v13, %v457_v12 }
 0x10d   :  { %542 = vst [vmem:[%s795_s3 + $0x8] sm:$0xff] %v540_v14  }

// kernel: dqn_forward.5
= control target key start
LH: loop header
LB: loop body
LE: loop exit
PB: predicated region body
PF: predicated region fallthrough
CT: control target
= control target key end

     0   :  { %s5472_s1 = inlined_call_operand.vmem [shape: bf16[2304,256], index: 1, kind: input, shape index: {}]   ;;  %s5473_s0 = inlined_call_operand.vmem [shape: bf16[16,2304], index: 0, kind: input, shape index: {}]   ;;  %s5474_s3 = inlined_call_operand.vmem [shape: bf16[256,512], index: 3, kind: input, shape index: {}]   ;;  %s5475_s5 = inlined_call_operand.vmem [shape: bf16[512,128], index: 5, kind: input, shape index: {}]   ;;  %s5476_s2 = inlined_call_operand.vmem [shape: f32[1,256], index: 2, kind: input, shape index: {}]   ;;  %s5477_s4 = inlined_call_operand.vmem [shape: f32[1,512], index: 4, kind: input, shape index: {}]   ;;  %s5478_s6 = inlined_call_operand.vmem [shape: f32[1,128], index: 6, kind: input, shape index: {}]   ;;  %s5479_s7 = inlined_call_operand.vmem [shape: f32[16,128], index: 7, kind: output, shape index: {}]  }
   0x1   :  { %v3606_v0 = vld [vmem:[%s5472_s1 + $0x304] ss:$8 sps:$4 sm:$0xff]   ;;  %v3608_v1 = vld [vmem:[%s5472_s1 + $0x300] ss:$8 sps:$4 sm:$0xff]   ;;  %v3609_v2 = vld [vmem:[%s5472_s1 + $0x314] ss:$8 sps:$4 sm:$0xff]  }
   0x2   :  { %2004 = vmatprep.subr.bf16.mxu0 %v3606_v0  ;;  %v3611_v3 = vld [vmem:[%s5472_s1 + $0x310] ss:$8 sps:$4 sm:$0xff]   ;;  %v3612_v4 = vld [vmem:[%s5472_s1 + $0x324] ss:$8 sps:$4 sm:$0xff]   ;;  %v3614_v5 = vld [vmem:[%s5472_s1 + $0x320] ss:$8 sps:$4 sm:$0xff]  }
   0x3   :  { %2005 = vmatpush1.bf16.msra.mxu0 %v3608_v1  ;;  %v3615_v6 = vld [vmem:[%s5472_s1 + $0x334] ss:$8 sps:$4 sm:$0xff]   ;;  %v3617_v7 = vld [vmem:[%s5472_s1 + $0x330] ss:$8 sps:$4 sm:$0xff]   ;;  %v3618_v8 = vld [vmem:[%s5472_s1 + $0x344] ss:$8 sps:$4 sm:$0xff]  }
   0x4   :  { %2006 = vmatprep.subr.bf16.mxu0 %v3609_v2  ;;  %v3620_v9 = vld [vmem:[%s5472_s1 + $0x340] ss:$8 sps:$4 sm:$0xff]   ;;  %v3621_v10 = vld [vmem:[%s5472_s1 + $0x354] ss:$8 sps:$4 sm:$0xff]   ;;  %v3623_v11 = vld [vmem:[%s5472_s1 + $0x350] ss:$8 sps:$4 sm:$0xff]  }
   0x5   :  { %v3624_v12 = vld [vmem:[%s5472_s1 + $0x364] ss:$8 sps:$4 sm:$0xff]   ;;  %v3626_v14 = vld [vmem:[%s5472_s1 + $0x360] ss:$8 sps:$4 sm:$0xff]   ;;  %v3657_v16 = vld [vmem:[%s5472_s1 + $0x14] ss:$8 sps:$4 sm:$0xff]  }
   0x6   :  { %v3651_v13 = vld [vmem:[%s5472_s1 + $0x4] ss:$8 sps:$4 sm:$0xff]   ;;  %v3655_v15 = vld [vmem:[%s5472_s1] ss:$8 sps:$4 sm:$0xff]   ;;  %v3627_v17 = vld [vmem:[%s5472_s1 + $0x374] ss:$8 sps:$4 sm:$0xff]  }
   0x7   :  { %2007 = vmatpush1.bf16.msra.mxu0 %v3611_v3  ;;  %1875 = vmatprep.subr.bf16.mxu1 %v3651_v13  ;;  %v3661_v18 = vld [vmem:[%s5473_s0 + $0x1c] ss:$72 sps:$4 sm:$0xff]   ;;  %v3629_v19 = vld [vmem:[%s5472_s1 + $0x370] ss:$8 sps:$4 sm:$0xff]   ;;  %v3671_v23 = vld [vmem:[%s5472_s1 + $0x20] ss:$8 sps:$4 sm:$0xff]  }
   0x8   :  { %2008 = vmatprep.subr.bf16.mxu0 %v3612_v4  ;;  %1876 = vmatpush1.bf16.msra.mxu1 %v3655_v15  ;;  %v3665_v20 = vld [vmem:[%s5472_s1 + $0x10] ss:$8 sps:$4 sm:$0xff]   ;;  %v3666_v21 = vld [vmem:[%s5472_s1 + $0x24] ss:$8 sps:$4 sm:$0xff]   ;;  %v3672_v24 = vld [vmem:[%s5472_s1 + $0x34] ss:$8 sps:$4 sm:$0xff]  }
   0x9   :  { %1877 = vmatprep.subr.bf16.mxu1 %v3657_v16  ;;  %2036 = vmatprep.mubr.bf16.mxu0 %v3661_v18  ;;  %v3630_v22 = vld [vmem:[%s5472_s1 + $0x384] ss:$8 sps:$4 sm:$0xff]   ;;  %v3632_v25 = vld [vmem:[%s5472_s1 + $0x380] ss:$8 sps:$4 sm:$0xff]   ;;  %v3633_v26 = vld [vmem:[%s5472_s1 + $0x394] ss:$8 sps:$4 sm:$0xff]  }
   0xa   :  { %v3677_v27 = vld [vmem:[%s5472_s1 + $0x30] ss:$8 sps:$4 sm:$0xff]   ;;  %v3678_v28 = vld [vmem:[%s5472_s1 + $0x44] ss:$8 sps:$4 sm:$0xff]   ;;  %v3683_v31 = vld [vmem:[%s5472_s1 + $0x40] ss:$8 sps:$4 sm:$0xff]  }
   0xb   :  { %2009 = vmatpush1.bf16.msra.mxu0 %v3614_v5  ;;  %v3635_v29 = vld [vmem:[%s5472_s1 + $0x390] ss:$8 sps:$4 sm:$0xff]   ;;  %v3636_v30 = vld [vmem:[%s5472_s1 + $0x3a4] ss:$8 sps:$4 sm:$0xff]   ;;  %v3684_v32 = vld [vmem:[%s5472_s1 + $0x54] ss:$8 sps:$4 sm:$0xff]  }
   0xc   :  { %2010 = vmatprep.subr.bf16.mxu0 %v3615_v6  ;;  %1878 = vmatpush1.bf16.msra.mxu1 %v3665_v20  ;;  %v3638_v33 = vld [vmem:[%s5472_s1 + $0x3a0] ss:$8 sps:$4 sm:$0xff]   ;;  %v3639_v34 = vld [vmem:[%s5472_s1 + $0x3b4] ss:$8 sps:$4 sm:$0xff]   ;;  %v3689_v35 = vld [vmem:[%s5472_s1 + $0x50] ss:$8 sps:$4 sm:$0xff]  }
   0xd   :  { %1879 = vmatprep.subr.bf16.mxu1 %v3666_v21  ;;  %v3690_v36 = vld [vmem:[%s5472_s1 + $0x64] ss:$8 sps:$4 sm:$0xff]   ;;  %v3641_v37 = vld [vmem:[%s5472_s1 + $0x3b0] ss:$8 sps:$4 sm:$0xff]   ;;  %v3695_v39 = vld [vmem:[%s5472_s1 + $0x60] ss:$8 sps:$4 sm:$0xff]  }
   0xe   :  { %v3642_v38 = vld [vmem:[%s5472_s1 + $0x3c4] ss:$8 sps:$4 sm:$0xff]   ;;  %v3696_v40 = vld [vmem:[%s5472_s1 + $0x74] ss:$8 sps:$4 sm:$0xff]   ;;  %v3644_v41 = vld [vmem:[%s5472_s1 + $0x3c0] ss:$8 sps:$4 sm:$0xff]  }
   0xf   :  { %2011 = vmatpush1.bf16.msra.mxu0 %v3617_v7  ;;  %v3645_v42 = vld [vmem:[%s5472_s1 + $0x3d4] ss:$8 sps:$4 sm:$0xff]   ;;  %v3701_v43 = vld [vmem:[%s5472_s1 + $0x70] ss:$8 sps:$4 sm:$0xff]   ;;  %v3702_v44 = vld [vmem:[%s5472_s1 + $0x84] ss:$8 sps:$4 sm:$0xff]  }
  0x10   :  { %2012 = vmatprep.subr.bf16.mxu0 %v3618_v8  ;;  %1880 = vmatpush1.bf16.msra.mxu1 %v3671_v23  ;;  %v3647_v45 = vld [vmem:[%s5472_s1 + $0x3d0] ss:$8 sps:$4 sm:$0xff]   ;;  %v3648_v46 = vld [vmem:[%s5472_s1 + $0x3e4] ss:$8 sps:$4 sm:$0xff]   ;;  %v3707_v47 = vld [vmem:[%s5472_s1 + $0x80] ss:$8 sps:$4 sm:$0xff]  }
  0x11   :  { %1881 = vmatprep.subr.bf16.mxu1 %v3672_v24  ;;  %v3708_v48 = vld [vmem:[%s5472_s1 + $0x94] ss:$8 sps:$4 sm:$0xff]   ;;  %v3650_v49 = vld [vmem:[%s5472_s1 + $0x3e0] ss:$8 sps:$4 sm:$0xff]   ;;  %v3713_v51 = vld [vmem:[%s5472_s1 + $0x90] ss:$8 sps:$4 sm:$0xff]  }
  0x12   :  { %v3653_v50 = vld [vmem:[%s5472_s1 + $0x3f4] ss:$8 sps:$4 sm:$0xff]   ;;  %v3714_v52 = vld [vmem:[%s5472_s1 + $0xa4] ss:$8 sps:$4 sm:$0xff]   ;;  %v3656_v53 = vld [vmem:[%s5472_s1 + $0x3f0] ss:$8 sps:$4 sm:$0xff]  }
  0x13   :  { %2013 = vmatpush1.bf16.msra.mxu0 %v3620_v9  ;;  %v3664_v54 = vld [vmem:[%s5472_s1 + $0x404] ss:$8 sps:$4 sm:$0xff]   ;;  %v3719_v55 = vld [vmem:[%s5472_s1 + $0xa0] ss:$8 sps:$4 sm:$0xff]   ;;  %v3720_v56 = vld [vmem:[%s5472_s1 + $0xb4] ss:$8 sps:$4 sm:$0xff]  }
  0x14   :  { %2014 = vmatprep.subr.bf16.mxu0 %v3621_v10  ;;  %1882 = vmatpush1.bf16.msra.mxu1 %v3677_v27  ;;  %v3659_v57 = vld [vmem:[%s5473_s0 + $0x18] ss:$72 sps:$4 sm:$0xff]   ;;  %v3670_v59 = vld [vmem:[%s5472_s1 + $0x414] ss:$8 sps:$4 sm:$0xff]   ;;  %v3726_v61 = vld [vmem:[%s5472_s1 + $0xc4] ss:$8 sps:$4 sm:$0xff]  }
  0x15   :  { %1883 = vmatprep.subr.bf16.mxu1 %v3678_v28  ;;  %v3662_v58 = vld [vmem:[%s5472_s1 + $0x400] ss:$8 sps:$4 sm:$0xff]   ;;  %v3725_v60 = vld [vmem:[%s5472_s1 + $0xb0] ss:$8 sps:$4 sm:$0xff]   ;;  %v3752_v62 = vld [vmem:[%s5473_s0 + $0x4] ss:$72 sps:$4 sm:$0xff]  }
  0x16   :  { %v3668_v63 = vld [vmem:[%s5472_s1 + $0x410] ss:$8 sps:$4 sm:$0xff]   ;;  %v3676_v0 = vld [vmem:[%s5472_s1 + $0x424] ss:$8 sps:$4 sm:$0xff]   ;;  %1907 = vmatprep.mubr.bf16.mxu1 %v3752_v62  ;;  %v3731_v1 = vld [vmem:[%s5472_s1 + $0xc0] ss:$8 sps:$4 sm:$0xff]  }
  0x17   :  { %2015 = vmatpush1.bf16.msra.mxu0 %v3623_v11  ;;  %v3732_v2 = vld [vmem:[%s5472_s1 + $0xd4] ss:$8 sps:$4 sm:$0xff]   ;;  %v3764_v3 = vld [vmem:[%s5473_s0 + $0x24] ss:$72 sps:$4 sm:$0xff]   ;;  %v3674_v4 = vld [vmem:[%s5472_s1 + $0x420] ss:$8 sps:$4 sm:$0xff]  }
  0x18   :  { %2016 = vmatprep.subr.bf16.mxu0 %v3624_v12  ;;  %1884 = vmatpush1.bf16.msra.mxu1 %v3683_v31  ;;  %v3682_v5 = vld [vmem:[%s5472_s1 + $0x434] ss:$8 sps:$4 sm:$0xff]   ;;  %v3737_v6 = vld [vmem:[%s5472_s1 + $0xd0] ss:$8 sps:$4 sm:$0xff]   ;;  %v3738_v7 = vld [vmem:[%s5472_s1 + $0xe4] ss:$8 sps:$4 sm:$0xff]  }
  0x19   :  { %1885 = vmatprep.subr.bf16.mxu1 %v3684_v32  ;;  %v3680_v8 = vld [vmem:[%s5472_s1 + $0x430] ss:$8 sps:$4 sm:$0xff]   ;;  %v3688_v9 = vld [vmem:[%s5472_s1 + $0x444] ss:$8 sps:$4 sm:$0xff]   ;;  %v3743_v10 = vld [vmem:[%s5472_s1 + $0xe0] ss:$8 sps:$4 sm:$0xff]  }
  0x1a   :  { %v3744_v11 = vld [vmem:[%s5472_s1 + $0xf4] ss:$8 sps:$4 sm:$0xff]   ;;  %v3686_v12 = vld [vmem:[%s5472_s1 + $0x440] ss:$8 sps:$4 sm:$0xff]   ;;  %v3755_v15 = vld [vmem:[%s5472_s1 + $0x104] ss:$8 sps:$4 sm:$0xff]  }
  0x1b   :  { %2017 = vmatpush1.bf16.msra.mxu0 %v3626_v14  ;;  %v3694_v13 = vld [vmem:[%s5472_s1 + $0x454] ss:$8 sps:$4 sm:$0xff]   ;;  %v3749_v14 = vld [vmem:[%s5472_s1 + $0xf0] ss:$8 sps:$4 sm:$0xff]   ;;  %v3750_v18 = vld [vmem:[%s5473_s0] ss:$72 sps:$4 sm:$0xff]  }
  0x1c   :  { %2018 = vmatprep.subr.bf16.mxu0 %v3627_v17  ;;  %1886 = vmatpush1.bf16.msra.mxu1 %v3689_v35  ;;  %v3692_v16 = vld [vmem:[%s5472_s1 + $0x450] ss:$8 sps:$4 sm:$0xff]   ;;  %v3700_v17 = vld [vmem:[%s5472_s1 + $0x464] ss:$8 sps:$4 sm:$0xff]   ;;  %v3761_v20 = vld [vmem:[%s5472_s1 + $0x114] ss:$8 sps:$4 sm:$0xff]  }
  0x1d   :  { %1887 = vmatprep.subr.bf16.mxu1 %v3690_v36  ;;  %v3698_v21 = vld [vmem:[%s5472_s1 + $0x460] ss:$8 sps:$4 sm:$0xff]   ;;  %v3759_v23 = vld [vmem:[%s5472_s1 + $0x110] ss:$8 sps:$4 sm:$0xff]   ;;  %v3770_v24 = vld [vmem:[%s5472_s1 + $0x124] ss:$8 sps:$4 sm:$0xff]  }
  0x1e   :  { %v3768_v27 = vld [vmem:[%s5472_s1 + $0x120] ss:$8 sps:$4 sm:$0xff]   ;;  %v3776_v28 = vld [vmem:[%s5472_s1 + $0x134] ss:$8 sps:$4 sm:$0xff]   ;;  %v3774_v31 = vld [vmem:[%s5472_s1 + $0x130] ss:$8 sps:$4 sm:$0xff]  }
  0x1f   :  { %2019 = vmatpush1.bf16.msra.mxu0 %v3629_v19  ;;  %v3753_v19 = vld [vmem:[%s5472_s1 + $0x100] ss:$8 sps:$4 sm:$0xff]   ;;  %v3782_v32 = vld [vmem:[%s5472_s1 + $0x144] ss:$8 sps:$4 sm:$0xff]   ;;  %v3788_v36 = vld [vmem:[%s5472_s1 + $0x154] ss:$8 sps:$4 sm:$0xff]  }
  0x20   :  { %2020 = vmatprep.subr.bf16.mxu0 %v3630_v22  ;;  %1888 = vmatpush1.bf16.msra.mxu1 %v3695_v39  ;;  %v3706_v22 = vld [vmem:[%s5472_s1 + $0x474] ss:$8 sps:$4 sm:$0xff]   ;;  %v3780_v35 = vld [vmem:[%s5472_s1 + $0x140] ss:$8 sps:$4 sm:$0xff]   ;;  %v3786_v39 = vld [vmem:[%s5472_s1 + $0x150] ss:$8 sps:$4 sm:$0xff]  }
  0x21   :  { %1889 = vmatprep.subr.bf16.mxu1 %v3696_v40  ;;  %v3794_v40 = vld [vmem:[%s5472_s1 + $0x164] ss:$8 sps:$4 sm:$0xff]   ;;  %v3762_v62 = vld [vmem:[%s5473_s0 + $0x20] ss:$72 sps:$4 sm:$0xff]  }
  0x23   :  { %2021 = vmatpush1.bf16.msra.mxu0 %v3632_v25  ;;  %v3704_v25 = vld [vmem:[%s5472_s1 + $0x470] ss:$8 sps:$4 sm:$0xff]  }
  0x24   :  { %2022 = vmatprep.subr.bf16.mxu0 %v3633_v26  ;;  %1890 = vmatpush1.bf16.msra.mxu1 %v3701_v43  ;;  %v3712_v26 = vld [vmem:[%s5472_s1 + $0x484] ss:$8 sps:$4 sm:$0xff]   ;;  %v3792_v43 = vld [vmem:[%s5472_s1 + $0x160] ss:$8 sps:$4 sm:$0xff]  }
  0x25   :  { %1891 = vmatprep.subr.bf16.mxu1 %v3702_v44  ;;  %v3800_v44 = vld [vmem:[%s5472_s1 + $0x174] ss:$8 sps:$4 sm:$0xff]  }
  0x27   :  { %2023 = vmatpush1.bf16.msra.mxu0 %v3635_v29  ;;  %v3710_v29 = vld [vmem:[%s5472_s1 + $0x480] ss:$8 sps:$4 sm:$0xff]  }
  0x28   :  { %2024 = vmatprep.subr.bf16.mxu0 %v3636_v30  ;;  %1892 = vmatpush1.bf16.msra.mxu1 %v3707_v47  ;;  %v3718_v30 = vld [vmem:[%s5472_s1 + $0x494] ss:$8 sps:$4 sm:$0xff]  }
  0x29   :  { %1893 = vmatprep.subr.bf16.mxu1 %v3708_v48  ;;  %v3742_v47 = vld [vmem:[%s5472_s1 + $0x4d4] ss:$8 sps:$4 sm:$0xff]   ;;  %v3798_v48 = vld [vmem:[%s5472_s1 + $0x170] ss:$8 sps:$4 sm:$0xff]  }
  0x2b   :  { %2025 = vmatpush1.bf16.msra.mxu0 %v3638_v33  ;;  %v3716_v33 = vld [vmem:[%s5472_s1 + $0x490] ss:$8 sps:$4 sm:$0xff]  }
  0x2c   :  { %2026 = vmatprep.subr.bf16.mxu0 %v3639_v34  ;;  %1894 = vmatpush1.bf16.msra.mxu1 %v3713_v51  ;;  %v3724_v34 = vld [vmem:[%s5472_s1 + $0x4a4] ss:$8 sps:$4 sm:$0xff]  }
  0x2d   :  { %1895 = vmatprep.subr.bf16.mxu1 %v3714_v52  ;;  %v3748_v51 = vld [vmem:[%s5472_s1 + $0x4e4] ss:$8 sps:$4 sm:$0xff]   ;;  %v3804_v52 = vld [vmem:[%s5472_s1 + $0x180] ss:$8 sps:$4 sm:$0xff]  }
  0x2f   :  { %2027 = vmatpush1.bf16.msra.mxu0 %v3641_v37  ;;  %v3722_v37 = vld [vmem:[%s5472_s1 + $0x4a0] ss:$8 sps:$4 sm:$0xff]  }
  0x30   :  { %2028 = vmatprep.subr.bf16.mxu0 %v3642_v38  ;;  %1896 = vmatpush1.bf16.msra.mxu1 %v3719_v55  ;;  %v3730_v38 = vld [vmem:[%s5472_s1 + $0x4b4] ss:$8 sps:$4 sm:$0xff]  }
  0x31   :  { %1897 = vmatprep.subr.bf16.mxu1 %v3720_v56  ;;  %v3758_v55 = vld [vmem:[%s5472_s1 + $0x4f4] ss:$8 sps:$4 sm:$0xff]   ;;  %v3810_v56 = vld [vmem:[%s5472_s1 + $0x190] ss:$8 sps:$4 sm:$0xff]  }
  0x33   :  { %2029 = vmatpush1.bf16.msra.mxu0 %v3644_v41  ;;  %v3728_v41 = vld [vmem:[%s5472_s1 + $0x4b0] ss:$8 sps:$4 sm:$0xff]  }
  0x34   :  { %2030 = vmatprep.subr.bf16.mxu0 %v3645_v42  ;;  %1898 = vmatpush1.bf16.msra.mxu1 %v3725_v60  ;;  %v3736_v42 = vld [vmem:[%s5472_s1 + $0x4c4] ss:$8 sps:$4 sm:$0xff]   ;;  %v3816_v60 = vld [vmem:[%s5472_s1 + $0x1a0] ss:$8 sps:$4 sm:$0xff]  }
  0x35   :  { %1899 = vmatprep.subr.bf16.mxu1 %v3726_v61  ;;  %v3824_v61 = vld [vmem:[%s5472_s1 + $0x1b4] ss:$8 sps:$4 sm:$0xff]  }
  0x37   :  { %2031 = vmatpush1.bf16.msra.mxu0 %v3647_v45  ;;  %v3854_v45 = vld [vmem:[%s5473_s0 + $0xc] ss:$72 sps:$4 sm:$0xff]  }
  0x38   :  { %2032 = vmatprep.subr.bf16.mxu0 %v3648_v46  ;;  %1900 = vmatpush1.bf16.msra.mxu1 %v3731_v1  ;;  %v3734_v46 = vld [vmem:[%s5472_s1 + $0x4c0] ss:$8 sps:$4 sm:$0xff]   ;;  %v3866_v1 = vld [vmem:[%s5473_s0 + $0x2c] ss:$72 sps:$4 sm:$0xff]  }
  0x39   :  { %1901 = vmatprep.subr.bf16.mxu1 %v3732_v2  ;;  %v3822_v2 = vld [vmem:[%s5472_s1 + $0x1b0] ss:$8 sps:$4 sm:$0xff]  }
  0x3b   :  { %2033 = vmatpush1.bf16.msra.mxu0 %v3650_v49  ;;  %v3806_v49 = vld [vmem:[%s5472_s1 + $0x184] ss:$8 sps:$4 sm:$0xff]  }
  0x3c   :  { %2034 = vmatprep.subr.bf16.mxu0 %v3653_v50  ;;  %1902 = vmatpush1.bf16.msra.mxu1 %v3737_v6  ;;  %v3740_v50 = vld [vmem:[%s5472_s1 + $0x4d0] ss:$8 sps:$4 sm:$0xff]   ;;  %v3828_v6 = vld [vmem:[%s5472_s1 + $0x1c0] ss:$8 sps:$4 sm:$0xff]  }
  0x3d   :  { %1903 = vmatprep.subr.bf16.mxu1 %v3738_v7  ;;  %v3836_v7 = vld [vmem:[%s5472_s1 + $0x1d4] ss:$8 sps:$4 sm:$0xff]  }
  0x3f   :  { %2035 = vmatpush1.bf16.msra.mxu0 %v3656_v53  ;;  %v3812_v53 = vld [vmem:[%s5472_s1 + $0x194] ss:$8 sps:$4 sm:$0xff]  }
  0x40   :  { %2047 = vmatprep.subr.bf16.mxu0 %v3664_v54  ;;  %1904 = vmatpush1.bf16.msra.mxu1 %v3743_v10  ;;  %v3746_v54 = vld [vmem:[%s5472_s1 + $0x4e0] ss:$8 sps:$4 sm:$0xff]   ;;  %v3834_v10 = vld [vmem:[%s5472_s1 + $0x1d0] ss:$8 sps:$4 sm:$0xff]  }
  0x41   :  { %1905 = vmatprep.subr.bf16.mxu1 %v3744_v11  ;;  %v3842_v11 = vld [vmem:[%s5472_s1 + $0x1e4] ss:$8 sps:$4 sm:$0xff]  }
  0x42   :  { %2037 = vmatmul.mubr.bf16.vlgmr.msra.gmra.mrb[0].mxu0 %v3659_v57  ;;  %v3818_v57 = vld [vmem:[%s5472_s1 + $0x1a4] ss:$8 sps:$4 sm:$0xff]  }
  0x43   :  { %2048 = vmatpush1.bf16.msra.mxu0 %v3662_v58  ;;  %2079 = vmatprep.mubr.bf16.mxu0 %v3764_v3  ;;  %v3756_v58 = vld [vmem:[%s5472_s1 + $0x4f0] ss:$8 sps:$4 sm:$0xff]   ;;  %v3830_v3 = vld [vmem:[%s5472_s1 + $0x1c4] ss:$8 sps:$4 sm:$0xff]  }
  0x44   :  { %2049 = vmatprep.subr.bf16.mxu0 %v3670_v59  ;;  %1906 = vmatpush1.bf16.msra.mxu1 %v3749_v14  ;;  %v3767_v59 = vld [vmem:[%s5472_s1 + $0x504] ss:$8 sps:$4 sm:$0xff]   ;;  %v3840_v14 = vld [vmem:[%s5472_s1 + $0x1e0] ss:$8 sps:$4 sm:$0xff]  }
  0x45   :  { %1918 = vmatprep.subr.bf16.mxu1 %v3755_v15  ;;  %v3848_v15 = vld [vmem:[%s5472_s1 + $0x1f4] ss:$8 sps:$4 sm:$0xff]  }
  0x47   :  { %2050 = vmatpush1.bf16.msra.mxu0 %v3668_v63  ;;  %1908 = vmatmul.mubr.bf16.vlgmr.msra.gmra.mrb[0].mxu1 %v3750_v18  ;;  %v3765_v63 = vld [vmem:[%s5472_s1 + $0x500] ss:$8 sps:$4 sm:$0xff]   ;;  %v3846_v18 = vld [vmem:[%s5472_s1 + $0x1f0] ss:$8 sps:$4 sm:$0xff]  }
  0x48   :  { %2051 = vmatprep.subr.bf16.mxu0 %v3676_v0  ;;  %1919 = vmatpush1.bf16.msra.mxu1 %v3753_v19  ;;  %v3773_v0 = vld [vmem:[%s5472_s1 + $0x514] ss:$8 sps:$4 sm:$0xff]   ;;  %v3857_v19 = vld [vmem:[%s5472_s1 + $0x204] ss:$8 sps:$4 sm:$0xff]  }
  0x49   :  { %1920 = vmatprep.subr.bf16.mxu1 %v3761_v20  ;;  %1950 = vmatprep.mubr.bf16.mxu1 %v3854_v45  ;;  %v3795_v20 = vld [vmem:[%s5472_s1 + $0x550] ss:$8 sps:$4 sm:$0xff]   ;;  %v3896_v45 = vld [vmem:[%s5472_s1 + $0x264] ss:$8 sps:$4 sm:$0xff]  }
  0x4b   :  { %2052 = vmatpush1.bf16.msra.mxu0 %v3674_v4  ;;  %v3771_v4 = vld [vmem:[%s5472_s1 + $0x510] ss:$8 sps:$4 sm:$0xff]  }
  0x4c   :  { %2053 = vmatprep.subr.bf16.mxu0 %v3682_v5  ;;  %1921 = vmatpush1.bf16.msra.mxu1 %v3759_v23  ;;  %v3779_v5 = vld [vmem:[%s5472_s1 + $0x524] ss:$8 sps:$4 sm:$0xff]   ;;  %v3855_v23 = vld [vmem:[%s5472_s1 + $0x200] ss:$8 sps:$4 sm:$0xff]  }
  0x4d   :  { %1922 = vmatprep.subr.bf16.mxu1 %v3770_v24  ;;  %v3863_v24 = vld [vmem:[%s5472_s1 + $0x214] ss:$8 sps:$4 sm:$0xff]  }
  0x4f   :  { %2054 = vmatpush1.bf16.msra.mxu0 %v3680_v8  ;;  %v3777_v8 = vld [vmem:[%s5472_s1 + $0x520] ss:$8 sps:$4 sm:$0xff]  }
  0x50   :  { %2055 = vmatprep.subr.bf16.mxu0 %v3688_v9  ;;  %1923 = vmatpush1.bf16.msra.mxu1 %v3768_v27  ;;  %v3785_v9 = vld [vmem:[%s5472_s1 + $0x534] ss:$8 sps:$4 sm:$0xff]   ;;  %v3861_v27 = vld [vmem:[%s5472_s1 + $0x210] ss:$8 sps:$4 sm:$0xff]  }
  0x51   :  { %1924 = vmatprep.subr.bf16.mxu1 %v3776_v28  ;;  %v3872_v28 = vld [vmem:[%s5472_s1 + $0x224] ss:$8 sps:$4 sm:$0xff]  }
  0x53   :  { %2056 = vmatpush1.bf16.msra.mxu0 %v3686_v12  ;;  %v3783_v12 = vld [vmem:[%s5472_s1 + $0x530] ss:$8 sps:$4 sm:$0xff]  }
  0x54   :  { %2057 = vmatprep.subr.bf16.mxu0 %v3694_v13  ;;  %1925 = vmatpush1.bf16.msra.mxu1 %v3774_v31  ;;  %v3791_v13 = vld [vmem:[%s5472_s1 + $0x544] ss:$8 sps:$4 sm:$0xff]   ;;  %v3956_v31 = vld [vmem:[%s5473_s0 + $0x14] ss:$72 sps:$4 sm:$0xff]  }
  0x55   :  { %1926 = vmatprep.subr.bf16.mxu1 %v3782_v32  ;;  %v3870_v32 = vld [vmem:[%s5472_s1 + $0x220] ss:$8 sps:$4 sm:$0xff]  }
  0x57   :  { %2058 = vmatpush1.bf16.msra.mxu0 %v3692_v16  ;;  %v3789_v16 = vld [vmem:[%s5472_s1 + $0x540] ss:$8 sps:$4 sm:$0xff]  }
  0x58   :  { %2059 = vmatprep.subr.bf16.mxu0 %v3700_v17  ;;  %1927 = vmatpush1.bf16.msra.mxu1 %v3780_v35  ;;  %v3797_v17 = vld [vmem:[%s5472_s1 + $0x554] ss:$8 sps:$4 sm:$0xff]  }
  0x59   :  { %1928 = vmatprep.subr.bf16.mxu1 %v3788_v36  ;;  %v3821_v35 = vld [vmem:[%s5472_s1 + $0x594] ss:$8 sps:$4 sm:$0xff]   ;;  %v3876_v36 = vld [vmem:[%s5472_s1 + $0x230] ss:$8 sps:$4 sm:$0xff]  }
  0x5b   :  { %2060 = vmatpush1.bf16.msra.mxu0 %v3698_v21  ;;  %v3803_v21 = vld [vmem:[%s5472_s1 + $0x564] ss:$8 sps:$4 sm:$0xff]  }
  0x5c   :  { %2061 = vmatprep.subr.bf16.mxu0 %v3706_v22  ;;  %1929 = vmatpush1.bf16.msra.mxu1 %v3786_v39  ;;  %v3852_v22 = vld [vmem:[%s5473_s0 + $0x8] ss:$72 sps:$4 sm:$0xff]   ;;  %v3827_v39 = vld [vmem:[%s5472_s1 + $0x5a4] ss:$8 sps:$4 sm:$0xff]  }
  0x5d   :  { %1930 = vmatprep.subr.bf16.mxu1 %v3794_v40  ;;  %v3882_v40 = vld [vmem:[%s5472_s1 + $0x240] ss:$8 sps:$4 sm:$0xff]  }
  0x5f   :  { %2062 = vmatpush1.bf16.msra.mxu0 %v3704_v25  ;;  %v3801_v25 = vld [vmem:[%s5472_s1 + $0x560] ss:$8 sps:$4 sm:$0xff]  }
  0x60   :  { %2063 = vmatprep.subr.bf16.mxu0 %v3712_v26  ;;  %1931 = vmatpush1.bf16.msra.mxu1 %v3792_v43  ;;  %v3809_v26 = vld [vmem:[%s5472_s1 + $0x574] ss:$8 sps:$4 sm:$0xff]  }
  0x61   :  { %1932 = vmatprep.subr.bf16.mxu1 %v3800_v44  ;;  %v3833_v43 = vld [vmem:[%s5472_s1 + $0x5b4] ss:$8 sps:$4 sm:$0xff]   ;;  %v3888_v44 = vld [vmem:[%s5472_s1 + $0x250] ss:$8 sps:$4 sm:$0xff]  }
  0x63   :  { %2064 = vmatpush1.bf16.msra.mxu0 %v3710_v29  ;;  %v3807_v29 = vld [vmem:[%s5472_s1 + $0x570] ss:$8 sps:$4 sm:$0xff]  }
  0x64   :  { %2065 = vmatprep.subr.bf16.mxu0 %v3718_v30  ;;  %1933 = vmatpush1.bf16.msra.mxu1 %v3798_v48  ;;  %v3815_v30 = vld [vmem:[%s5472_s1 + $0x584] ss:$8 sps:$4 sm:$0xff]   ;;  %v3894_v48 = vld [vmem:[%s5472_s1 + $0x260] ss:$8 sps:$4 sm:$0xff]  }
  0x65   :  { %1934 = vmatprep.subr.bf16.mxu1 %v3806_v49  ;;  %v3902_v49 = vld [vmem:[%s5472_s1 + $0x274] ss:$8 sps:$4 sm:$0xff]  }
  0x67   :  { %2066 = vmatpush1.bf16.msra.mxu0 %v3716_v33  ;;  %v3878_v33 = vld [vmem:[%s5472_s1 + $0x234] ss:$8 sps:$4 sm:$0xff]  }
  0x68   :  { %2067 = vmatprep.subr.bf16.mxu0 %v3724_v34  ;;  %1935 = vmatpush1.bf16.msra.mxu1 %v3804_v52  ;;  %v3813_v34 = vld [vmem:[%s5472_s1 + $0x580] ss:$8 sps:$4 sm:$0xff]   ;;  %v3900_v52 = vld [vmem:[%s5472_s1 + $0x270] ss:$8 sps:$4 sm:$0xff]  }
  0x69   :  { %1936 = vmatprep.subr.bf16.mxu1 %v3812_v53  ;;  %v3908_v53 = vld [vmem:[%s5472_s1 + $0x284] ss:$8 sps:$4 sm:$0xff]  }
  0x6b   :  { %2068 = vmatpush1.bf16.msra.mxu0 %v3722_v37  ;;  %v3884_v37 = vld [vmem:[%s5472_s1 + $0x244] ss:$8 sps:$4 sm:$0xff]  }
  0x6c   :  { %2069 = vmatprep.subr.bf16.mxu0 %v3730_v38  ;;  %1937 = vmatpush1.bf16.msra.mxu1 %v3810_v56  ;;  %v3819_v38 = vld [vmem:[%s5472_s1 + $0x590] ss:$8 sps:$4 sm:$0xff]   ;;  %v3906_v56 = vld [vmem:[%s5472_s1 + $0x280] ss:$8 sps:$4 sm:$0xff]  }
  0x6d   :  { %1938 = vmatprep.subr.bf16.mxu1 %v3818_v57  ;;  %v3914_v57 = vld [vmem:[%s5472_s1 + $0x294] ss:$8 sps:$4 sm:$0xff]  }
  0x6f   :  { %2070 = vmatpush1.bf16.msra.mxu0 %v3728_v41  ;;  %v3890_v41 = vld [vmem:[%s5472_s1 + $0x254] ss:$8 sps:$4 sm:$0xff]  }
  0x70   :  { %2071 = vmatprep.subr.bf16.mxu0 %v3736_v42  ;;  %1939 = vmatpush1.bf16.msra.mxu1 %v3816_v60  ;;  %v3825_v42 = vld [vmem:[%s5472_s1 + $0x5a0] ss:$8 sps:$4 sm:$0xff]   ;;  %v3912_v60 = vld [vmem:[%s5472_s1 + $0x290] ss:$8 sps:$4 sm:$0xff]  }
  0x71   :  { %1940 = vmatprep.subr.bf16.mxu1 %v3824_v61  ;;  %v3920_v61 = vld [vmem:[%s5472_s1 + $0x2a4] ss:$8 sps:$4 sm:$0xff]  }
  0x73   :  { %2072 = vmatpush1.bf16.msra.mxu0 %v3734_v46  ;;  %v3831_v46 = vld [vmem:[%s5472_s1 + $0x5b0] ss:$8 sps:$4 sm:$0xff]  }
  0x74   :  { %2073 = vmatprep.subr.bf16.mxu0 %v3742_v47  ;;  %1941 = vmatpush1.bf16.msra.mxu1 %v3822_v2  ;;  %v3839_v47 = vld [vmem:[%s5472_s1 + $0x5c4] ss:$8 sps:$4 sm:$0xff]   ;;  %v3864_v2 = vld [vmem:[%s5473_s0 + $0x28] ss:$72 sps:$4 sm:$0xff]  }
  0x75   :  { %1942 = vmatprep.subr.bf16.mxu1 %v3830_v3  ;;  %v3867_v3 = vld [vmem:[%s5472_s1 + $0x600] ss:$8 sps:$4 sm:$0xff]  }
  0x77   :  { %2074 = vmatpush1.bf16.msra.mxu0 %v3740_v50  ;;  %v3837_v50 = vld [vmem:[%s5472_s1 + $0x5c0] ss:$8 sps:$4 sm:$0xff]  }
  0x78   :  { %2075 = vmatprep.subr.bf16.mxu0 %v3748_v51  ;;  %1943 = vmatpush1.bf16.msra.mxu1 %v3828_v6  ;;  %v3845_v51 = vld [vmem:[%s5472_s1 + $0x5d4] ss:$8 sps:$4 sm:$0xff]   ;;  %v3924_v6 = vld [vmem:[%s5472_s1 + $0x2b0] ss:$8 sps:$4 sm:$0xff]  }
  0x79   :  { %1944 = vmatprep.subr.bf16.mxu1 %v3836_v7  ;;  %v3932_v7 = vld [vmem:[%s5472_s1 + $0x2c4] ss:$8 sps:$4 sm:$0xff]  }
  0x7b   :  { %2076 = vmatpush1.bf16.msra.mxu0 %v3746_v54  ;;  %v3843_v54 = vld [vmem:[%s5472_s1 + $0x5d0] ss:$8 sps:$4 sm:$0xff]  }
  0x7c   :  { %2077 = vmatprep.subr.bf16.mxu0 %v3758_v55  ;;  %1945 = vmatpush1.bf16.msra.mxu1 %v3834_v10  ;;  %v3851_v55 = vld [vmem:[%s5472_s1 + $0x5e4] ss:$8 sps:$4 sm:$0xff]   ;;  %v3930_v10 = vld [vmem:[%s5472_s1 + $0x2c0] ss:$8 sps:$4 sm:$0xff]  }
  0x7d   :  { %1946 = vmatprep.subr.bf16.mxu1 %v3842_v11  ;;  %v3938_v11 = vld [vmem:[%s5472_s1 + $0x2d4] ss:$8 sps:$4 sm:$0xff]  }
  0x7f   :  { %2078 = vmatpush1.bf16.msra.mxu0 %v3756_v58  ;;  %v3849_v58 = vld [vmem:[%s5472_s1 + $0x5e0] ss:$8 sps:$4 sm:$0xff]  }
  0x80   :  { %2090 = vmatprep.subr.bf16.mxu0 %v3767_v59  ;;  %1947 = vmatpush1.bf16.msra.mxu1 %v3840_v14  ;;  %v3860_v59 = vld [vmem:[%s5472_s1 + $0x5f4] ss:$8 sps:$4 sm:$0xff]   ;;  %v3936_v14 = vld [vmem:[%s5472_s1 + $0x2d0] ss:$8 sps:$4 sm:$0xff]  }
  0x81   :  { %1948 = vmatprep.subr.bf16.mxu1 %v3848_v15  ;;  %v3944_v15 = vld [vmem:[%s5472_s1 + $0x2e4] ss:$8 sps:$4 sm:$0xff]  }
  0x82   :  { %2080 = vmatmul.mubr.bf16.vlgmr.msra.gmra.mrb[0].mxu0 %v3762_v62  ;;  %v3858_v62 = vld [vmem:[%s5472_s1 + $0x5f0] ss:$8 sps:$4 sm:$0xff]  }
  0x83   :  { %2091 = vmatpush1.bf16.msra.mxu0 %v3765_v63  ;;  %2122 = vmatprep.mubr.bf16.mxu0 %v3866_v1  ;;  %v3869_v63 = vld [vmem:[%s5472_s1 + $0x604] ss:$8 sps:$4 sm:$0xff]   ;;  %v3926_v1 = vld [vmem:[%s5472_s1 + $0x2b4] ss:$8 sps:$4 sm:$0xff]  }
  0x84   :  { %2092 = vmatprep.subr.bf16.mxu0 %v3773_v0  ;;  %1949 = vmatpush1.bf16.msra.mxu1 %v3846_v18  ;;  %v3918_v0 = vld [vmem:[%s5472_s1 + $0x2a0] ss:$8 sps:$4 sm:$0xff]  }
  0x85   :  { %1961 = vmatprep.subr.bf16.mxu1 %v3857_v19  ;;  %v3942_v18 = vld [vmem:[%s5472_s1 + $0x2e0] ss:$8 sps:$4 sm:$0xff]   ;;  %v3950_v19 = vld [vmem:[%s5472_s1 + $0x2f4] ss:$8 sps:$4 sm:$0xff]  }
  0x87   :  { %2093 = vmatpush1.bf16.msra.mxu0 %v3771_v4  ;;  %1951 = vmatmul.mubr.bf16.vlgmr.msra.gmra.mrb[0].mxu1 %v3852_v22  ;;  %v3875_v4 = vld [vmem:[%s5472_s1 + $0x614] ss:$8 sps:$4 sm:$0xff]   ;;  %v3948_v22 = vld [vmem:[%s5472_s1 + $0x2f0] ss:$8 sps:$4 sm:$0xff]  }
  0x88   :  { %2094 = vmatprep.subr.bf16.mxu0 %v3779_v5  ;;  %1962 = vmatpush1.bf16.msra.mxu1 %v3855_v23  ;;  %v3962_v5 = vld [vmem:[%s5473_s0 + $0x34] ss:$72 sps:$4 sm:$0xff]   ;;  %v3897_v23 = vld [vmem:[%s5472_s1 + $0x650] ss:$8 sps:$4 sm:$0xff]  }
  0x89   :  { %1963 = vmatprep.subr.bf16.mxu1 %v3863_v24  ;;  %1993 = vmatprep.mubr.bf16.mxu1 %v3956_v31  ;;  %v3954_v24 = vld [vmem:[%s5473_s0 + $0x10] ss:$72 sps:$4 sm:$0xff]   ;;  %v3923_v31 = vld [vmem:[%s5472_s1 + $0x694] ss:$8 sps:$4 sm:$0xff]  }
  0x8b   :  { %2095 = vmatpush1.bf16.msra.mxu0 %v3777_v8  ;;  %v3873_v8 = vld [vmem:[%s5472_s1 + $0x610] ss:$8 sps:$4 sm:$0xff]  }
  0x8c   :  { %2096 = vmatprep.subr.bf16.mxu0 %v3785_v9  ;;  %1964 = vmatpush1.bf16.msra.mxu1 %v3861_v27  ;;  %v3881_v9 = vld [vmem:[%s5472_s1 + $0x624] ss:$8 sps:$4 sm:$0xff]   ;;  %v3911_v27 = vld [vmem:[%s5472_s1 + $0x674] ss:$8 sps:$4 sm:$0xff]  }
  0x8d   :  { %1965 = vmatprep.subr.bf16.mxu1 %v3872_v28  ;;  %v3909_v28 = vld [vmem:[%s5472_s1 + $0x670] ss:$8 sps:$4 sm:$0xff]  }
  0x8f   :  { %2097 = vmatpush1.bf16.msra.mxu0 %v3783_v12  ;;  %v3879_v12 = vld [vmem:[%s5472_s1 + $0x620] ss:$8 sps:$4 sm:$0xff]  }
  0x90   :  { %2098 = vmatprep.subr.bf16.mxu0 %v3791_v13  ;;  %1966 = vmatpush1.bf16.msra.mxu1 %v3870_v32  ;;  %v3887_v13 = vld [vmem:[%s5472_s1 + $0x634] ss:$8 sps:$4 sm:$0xff]   ;;  %v3921_v32 = vld [vmem:[%s5472_s1 + $0x690] ss:$8 sps:$4 sm:$0xff]  }
  0x91   :  { %1967 = vmatprep.subr.bf16.mxu1 %v3878_v33  ;;  %v3929_v33 = vld [vmem:[%s5472_s1 + $0x6a4] ss:$8 sps:$4 sm:$0xff]  }
  0x93   :  { %2099 = vmatpush1.bf16.msra.mxu0 %v3789_v16  ;;  %v3885_v16 = vld [vmem:[%s5472_s1 + $0x630] ss:$8 sps:$4 sm:$0xff]  }
  0x94   :  { %2100 = vmatprep.subr.bf16.mxu0 %v3797_v17  ;;  %1968 = vmatpush1.bf16.msra.mxu1 %v3876_v36  ;;  %v3893_v17 = vld [vmem:[%s5472_s1 + $0x644] ss:$8 sps:$4 sm:$0xff]   ;;  %v3933_v36 = vld [vmem:[%s5472_s1 + $0x6b0] ss:$8 sps:$4 sm:$0xff]  }
  0x95   :  { %1969 = vmatprep.subr.bf16.mxu1 %v3884_v37  ;;  %v3941_v37 = vld [vmem:[%s5472_s1 + $0x6c4] ss:$8 sps:$4 sm:$0xff]  }
  0x97   :  { %2101 = vmatpush1.bf16.msra.mxu0 %v3795_v20  ;;  %v3891_v20 = vld [vmem:[%s5472_s1 + $0x640] ss:$8 sps:$4 sm:$0xff]  }
  0x98   :  { %2102 = vmatprep.subr.bf16.mxu0 %v3803_v21  ;;  %1970 = vmatpush1.bf16.msra.mxu1 %v3882_v40  ;;  %v3899_v21 = vld [vmem:[%s5472_s1 + $0x654] ss:$8 sps:$4 sm:$0xff]   ;;  %v3945_v40 = vld [vmem:[%s5472_s1 + $0x6d0] ss:$8 sps:$4 sm:$0xff]  }
  0x99   :  { %1971 = vmatprep.subr.bf16.mxu1 %v3890_v41  ;;  %v3953_v41 = vld [vmem:[%s5472_s1 + $0x6e4] ss:$8 sps:$4 sm:$0xff]  }
  0x9b   :  { %2103 = vmatpush1.bf16.msra.mxu0 %v3801_v25  ;;  %v3905_v25 = vld [vmem:[%s5472_s1 + $0x664] ss:$8 sps:$4 sm:$0xff]  }
  0x9c   :  { %2104 = vmatprep.subr.bf16.mxu0 %v3809_v26  ;;  %1972 = vmatpush1.bf16.msra.mxu1 %v3888_v44  ;;  %v3903_v26 = vld [vmem:[%s5472_s1 + $0x660] ss:$8 sps:$4 sm:$0xff]   ;;  %v3957_v44 = vld [vmem:[%s5472_s1 + $0x6f0] ss:$8 sps:$4 sm:$0xff]  }
  0x9d   :  { %1973 = vmatprep.subr.bf16.mxu1 %v3896_v45  ;;  %v3965_v45 = vld [vmem:[%s5472_s1 + $0x704] ss:$8 sps:$4 sm:$0xff]  }
  0x9f   :  { %2105 = vmatpush1.bf16.msra.mxu0 %v3807_v29  ;;  %v3917_v29 = vld [vmem:[%s5472_s1 + $0x684] ss:$8 sps:$4 sm:$0xff]  }
  0xa0   :  { %2106 = vmatprep.subr.bf16.mxu0 %v3815_v30  ;;  %1974 = vmatpush1.bf16.msra.mxu1 %v3894_v48  ;;  %v3915_v30 = vld [vmem:[%s5472_s1 + $0x680] ss:$8 sps:$4 sm:$0xff]   ;;  %v4013_v48 = vld [vmem:[%s5473_s0 + $0x3c] ss:$72 sps:$4 sm:$0xff]  }
  0xa1   :  { %1975 = vmatprep.subr.bf16.mxu1 %v3902_v49  ;;  %v3968_v49 = vld [vmem:[%s5472_s1 + $0x714] ss:$8 sps:$4 sm:$0xff]  }
  0xa3   :  { %2107 = vmatpush1.bf16.msra.mxu0 %v3813_v34  ;;  %v3927_v34 = vld [vmem:[%s5472_s1 + $0x6a0] ss:$8 sps:$4 sm:$0xff]  }
  0xa4   :  { %2108 = vmatprep.subr.bf16.mxu0 %v3821_v35  ;;  %1976 = vmatpush1.bf16.msra.mxu1 %v3900_v52  ;;  %v3935_v35 = vld [vmem:[%s5472_s1 + $0x6b4] ss:$8 sps:$4 sm:$0xff]   ;;  %v3969_v52 = vld [vmem:[%s5472_s1 + $0x720] ss:$8 sps:$4 sm:$0xff]  }
  0xa5   :  { %1977 = vmatprep.subr.bf16.mxu1 %v3908_v53  ;;  %v3974_v53 = vld [vmem:[%s5472_s1 + $0x734] ss:$8 sps:$4 sm:$0xff]  }
  0xa7   :  { %2109 = vmatpush1.bf16.msra.mxu0 %v3819_v38  ;;  %v3939_v38 = vld [vmem:[%s5472_s1 + $0x6c0] ss:$8 sps:$4 sm:$0xff]  }
  0xa8   :  { %2110 = vmatprep.subr.bf16.mxu0 %v3827_v39  ;;  %1978 = vmatpush1.bf16.msra.mxu1 %v3906_v56  ;;  %v3947_v39 = vld [vmem:[%s5472_s1 + $0x6d4] ss:$8 sps:$4 sm:$0xff]   ;;  %v3975_v56 = vld [vmem:[%s5472_s1 + $0x740] ss:$8 sps:$4 sm:$0xff]  }
  0xa9   :  { %1979 = vmatprep.subr.bf16.mxu1 %v3914_v57  ;;  %v3980_v57 = vld [vmem:[%s5472_s1 + $0x754] ss:$8 sps:$4 sm:$0xff]  }
  0xab   :  { %2111 = vmatpush1.bf16.msra.mxu0 %v3825_v42  ;;  %v3951_v42 = vld [vmem:[%s5472_s1 + $0x6e0] ss:$8 sps:$4 sm:$0xff]  }
  0xac   :  { %2112 = vmatprep.subr.bf16.mxu0 %v3833_v43  ;;  %1980 = vmatpush1.bf16.msra.mxu1 %v3912_v60  ;;  %v3959_v43 = vld [vmem:[%s5472_s1 + $0x6f4] ss:$8 sps:$4 sm:$0xff]   ;;  %v3981_v60 = vld [vmem:[%s5472_s1 + $0x760] ss:$8 sps:$4 sm:$0xff]  }
  0xad   :  { %1981 = vmatprep.subr.bf16.mxu1 %v3920_v61  ;;  %v3986_v61 = vld [vmem:[%s5472_s1 + $0x774] ss:$8 sps:$4 sm:$0xff]  }
  0xaf   :  { %2113 = vmatpush1.bf16.msra.mxu0 %v3831_v46  ;;  %v3960_v46 = vld [vmem:[%s5473_s0 + $0x30] ss:$72 sps:$4 sm:$0xff]  }
  0xb0   :  { %2114 = vmatprep.subr.bf16.mxu0 %v3839_v47  ;;  %1982 = vmatpush1.bf16.msra.mxu1 %v3918_v0  ;;  %v3963_v47 = vld [vmem:[%s5472_s1 + $0x700] ss:$8 sps:$4 sm:$0xff]  }
  0xb1   :  { %1983 = vmatprep.subr.bf16.mxu1 %v3926_v1  ;;  %v3987_v0 = vld [vmem:[%s5472_s1 + $0x780] ss:$8 sps:$4 sm:$0xff]   ;;  %v3992_v1 = vld [vmem:[%s5472_s1 + $0x794] ss:$8 sps:$4 sm:$0xff]  }
  0xb3   :  { %2115 = vmatpush1.bf16.msra.mxu0 %v3837_v50  ;;  %v3966_v50 = vld [vmem:[%s5472_s1 + $0x710] ss:$8 sps:$4 sm:$0xff]  }
  0xb4   :  { %2116 = vmatprep.subr.bf16.mxu0 %v3845_v51  ;;  %1984 = vmatpush1.bf16.msra.mxu1 %v3924_v6  ;;  %v3971_v51 = vld [vmem:[%s5472_s1 + $0x724] ss:$8 sps:$4 sm:$0xff]   ;;  %v3996_v6 = vld [vmem:[%s5472_s1 + $0x7b0] ss:$8 sps:$4 sm:$0xff]  }
  0xb5   :  { %1985 = vmatprep.subr.bf16.mxu1 %v3932_v7  ;;  %v4001_v7 = vld [vmem:[%s5472_s1 + $0x7c4] ss:$8 sps:$4 sm:$0xff]  }
  0xb7   :  { %2117 = vmatpush1.bf16.msra.mxu0 %v3843_v54  ;;  %v3972_v54 = vld [vmem:[%s5472_s1 + $0x730] ss:$8 sps:$4 sm:$0xff]  }
  0xb8   :  { %2118 = vmatprep.subr.bf16.mxu0 %v3851_v55  ;;  %1986 = vmatpush1.bf16.msra.mxu1 %v3930_v10  ;;  %v3977_v55 = vld [vmem:[%s5472_s1 + $0x744] ss:$8 sps:$4 sm:$0xff]   ;;  %v4065_v10 = vld [vmem:[%s5474_s3] ss:$16 sps:$4 sm:$0xff]  }
  0xb9   :  { %1987 = vmatprep.subr.bf16.mxu1 %v3938_v11  ;;  %v4067_v11 = vld [vmem:[%s5474_s3 + $0x4] ss:$16 sps:$4 sm:$0xff]  }
  0xbb   :  { %2119 = vmatpush1.bf16.msra.mxu0 %v3849_v58  ;;  %v3978_v58 = vld [vmem:[%s5472_s1 + $0x750] ss:$8 sps:$4 sm:$0xff]  }
  0xbc   :  { %2120 = vmatprep.subr.bf16.mxu0 %v3860_v59  ;;  %1988 = vmatpush1.bf16.msra.mxu1 %v3936_v14  ;;  %v3983_v59 = vld [vmem:[%s5472_s1 + $0x764] ss:$8 sps:$4 sm:$0xff]  }
  0xbd   :  { %1989 = vmatprep.subr.bf16.mxu1 %v3944_v15  ;;  %v4007_v14 = vld [vmem:[%s5472_s1 + $0x7e4] ss:$8 sps:$4 sm:$0xff]   ;;  %v4068_v15 = vld [vmem:[%s5474_s3 + $0x20] ss:$16 sps:$4 sm:$0xff]  }
  0xbf   :  { %2121 = vmatpush1.bf16.msra.mxu0 %v3858_v62  ;;  %v3984_v62 = vld [vmem:[%s5472_s1 + $0x770] ss:$8 sps:$4 sm:$0xff]  }
  0xc0   :  { %2133 = vmatprep.subr.bf16.mxu0 %v3869_v63  ;;  %1990 = vmatpush1.bf16.msra.mxu1 %v3942_v18  ;;  %v3989_v63 = vld [vmem:[%s5472_s1 + $0x784] ss:$8 sps:$4 sm:$0xff]   ;;  %v4010_v18 = vld [vmem:[%s5472_s1 + $0x7f4] ss:$8 sps:$4 sm:$0xff]  }
  0xc1   :  { %1991 = vmatprep.subr.bf16.mxu1 %v3950_v19  ;;  %v4071_v19 = vld [vmem:[%s5474_s3 + $0x40] ss:$16 sps:$4 sm:$0xff]  }
  0xc2   :  { %2123 = vmatmul.mubr.bf16.vlgmr.msra.gmra.mrb[0].mxu0 %v3864_v2  ;;  %v3990_v2 = vld [vmem:[%s5472_s1 + $0x790] ss:$8 sps:$4 sm:$0xff]  }
  0xc3   :  { %2134 = vmatpush1.bf16.msra.mxu0 %v3867_v3  ;;  %2165 = vmatprep.mubr.bf16.mxu0 %v3962_v5  ;;  %v3995_v3 = vld [vmem:[%s5472_s1 + $0x7a4] ss:$8 sps:$4 sm:$0xff]   ;;  %v3998_v5 = vld [vmem:[%s5472_s1 + $0x7b4] ss:$8 sps:$4 sm:$0xff]  }
  0xc4   :  { %2135 = vmatprep.subr.bf16.mxu0 %v3875_v4  ;;  %1992 = vmatpush1.bf16.msra.mxu1 %v3948_v22  ;;  %v3993_v4 = vld [vmem:[%s5472_s1 + $0x7a0] ss:$8 sps:$4 sm:$0xff]   ;;  %v4016_v22 = vld [vmem:[%s5472_s1 + $0x804] ss:$8 sps:$4 sm:$0xff]  }
  0xc5   :  { %2674 = vmatprep.subr.bf16.mxu1 %v4067_v11  ;;  %v4061_v11 = vld [vmem:[%s5472_s1 + $0x8f4] ss:$8 sps:$4 sm:$0xff]  }
  0xc7   :  { %2136 = vmatpush1.bf16.msra.mxu0 %v3873_v8  ;;  %1994 = vmatmul.mubr.bf16.vlgmr.msra.gmra.mrb[0].mxu1 %v3954_v24  ;;  %v3999_v8 = vld [vmem:[%s5472_s1 + $0x7c0] ss:$8 sps:$4 sm:$0xff]   ;;  %v4079_v24 = vld [vmem:[%s5474_s3 + $0x84] ss:$16 sps:$4 sm:$0xff]  }
  0xc8   :  { %2137 = vmatprep.subr.bf16.mxu0 %v3881_v9  ;;  %v4004_v9 = vld [vmem:[%s5472_s1 + $0x7d4] ss:$8 sps:$4 sm:$0xff]   ;;  %2675 = vmatpush1.bf16.msra.mxu1 %v4065_v10  ;;  %v4056_v10 = vld [vmem:[%s5472_s1 + $0x8e0] ss:$8 sps:$4 sm:$0xff]  }
  0xcb   :  { %2138 = vmatpush1.bf16.msra.mxu0 %v3879_v12  ;;  %v4070_v12 = vld [vmem:[%s5474_s3 + $0x24] ss:$16 sps:$4 sm:$0xff]  }
  0xcc   :  { %2139 = vmatprep.subr.bf16.mxu0 %v3887_v13  ;;  %v4002_v13 = vld [vmem:[%s5472_s1 + $0x7d0] ss:$8 sps:$4 sm:$0xff]   ;;  %2676 = vmatprep.subr.bf16.mxu1 %v4070_v12 }
  0xcd   :  { %2677 = vmatpush1.bf16.msra.mxu1 %v4068_v15  ;;  %v4059_v12 = vld [vmem:[%s5472_s1 + $0x8f0] ss:$8 sps:$4 sm:$0xff]  }
  0xcf   :  { %2140 = vmatpush1.bf16.msra.mxu0 %v3885_v16  ;;  %v4073_v16 = vld [vmem:[%s5474_s3 + $0x44] ss:$16 sps:$4 sm:$0xff]  }
  0xd0   :  { %2141 = vmatprep.subr.bf16.mxu0 %v3893_v17  ;;  %v4005_v17 = vld [vmem:[%s5472_s1 + $0x7e0] ss:$8 sps:$4 sm:$0xff]   ;;  %2678 = vmatprep.subr.bf16.mxu1 %v4073_v16 }
  0xd1   :  { %2679 = vmatpush1.bf16.msra.mxu1 %v4071_v19  ;;  %v4107_v19 = vld [vmem:[%s5474_s3 + $0x1c0] ss:$16 sps:$4 sm:$0xff]  }
  0xd3   :  { %2142 = vmatpush1.bf16.msra.mxu0 %v3891_v20  ;;  %v4076_v20 = vld [vmem:[%s5474_s3 + $0x64] ss:$16 sps:$4 sm:$0xff]  }
  0xd4   :  { %2143 = vmatprep.subr.bf16.mxu0 %v3899_v21  ;;  %v4008_v21 = vld [vmem:[%s5472_s1 + $0x7f0] ss:$8 sps:$4 sm:$0xff]   ;;  %2680 = vmatprep.subr.bf16.mxu1 %v4076_v20  ;;  %v4112_v20 = vld [vmem:[%s5474_s3 + $0x1e4] ss:$16 sps:$4 sm:$0xff]  }
  0xd7   :  { %2144 = vmatpush1.bf16.msra.mxu0 %v3897_v23  ;;  %v4074_v23 = vld [vmem:[%s5474_s3 + $0x60] ss:$16 sps:$4 sm:$0xff]  }
  0xd8   :  { %2145 = vmatprep.subr.bf16.mxu0 %v3905_v25  ;;  %v4011_v25 = vld [vmem:[%s5473_s0 + $0x38] ss:$72 sps:$4 sm:$0xff]   ;;  %2681 = vmatpush1.bf16.msra.mxu1 %v4074_v23  ;;  %v335_v23 = vlaneseq }
  0xd9   :  { %2682 = vmatprep.subr.bf16.mxu1 %v4079_v24 }
  0xda   :  { %v5250_v24 = vshrl.u32 %v335_v23, 7  ;;  %v4169_v23 = vld [vmem:[%s5475_s5 + $0x60] sm:$0xff]  }
  0xdb   :  { %2146 = vmatpush1.bf16.msra.mxu0 %v3903_v26  ;;  %v4014_v26 = vld [vmem:[%s5472_s1 + $0x800] ss:$8 sps:$4 sm:$0xff]  }
  0xdc   :  { %2147 = vmatprep.subr.bf16.mxu0 %v3911_v27  ;;  %v4019_v27 = vld [vmem:[%s5472_s1 + $0x814] ss:$8 sps:$4 sm:$0xff]  }
  0xdf   :  { %2148 = vmatpush1.bf16.msra.mxu0 %v3909_v28  ;;  %v4064_v28 = vld [vmem:[%s5473_s0 + $0x44] ss:$72 sps:$4 sm:$0xff]  }
  0xe0   :  { %2149 = vmatprep.subr.bf16.mxu0 %v3917_v29  ;;  %v4077_v29 = vld [vmem:[%s5474_s3 + $0x80] ss:$16 sps:$4 sm:$0xff]  }
  0xe1   :  { %2683 = vmatpush1.bf16.msra.mxu1 %v4077_v29 }
  0xe3   :  { %2150 = vmatpush1.bf16.msra.mxu0 %v3915_v30  ;;  %v4017_v30 = vld [vmem:[%s5472_s1 + $0x810] ss:$8 sps:$4 sm:$0xff]  }
  0xe4   :  { %2151 = vmatprep.subr.bf16.mxu0 %v3923_v31  ;;  %v4082_v31 = vld [vmem:[%s5474_s3 + $0xa4] ss:$16 sps:$4 sm:$0xff]  }
  0xe5   :  { %2684 = vmatprep.subr.bf16.mxu1 %v4082_v31 }
  0xe7   :  { %2152 = vmatpush1.bf16.msra.mxu0 %v3921_v32  ;;  %v4022_v32 = vld [vmem:[%s5472_s1 + $0x824] ss:$8 sps:$4 sm:$0xff]  }
  0xe8   :  { %2153 = vmatprep.subr.bf16.mxu0 %v3929_v33  ;;  %v4080_v33 = vld [vmem:[%s5474_s3 + $0xa0] ss:$16 sps:$4 sm:$0xff]  }
  0xe9   :  { %2685 = vmatpush1.bf16.msra.mxu1 %v4080_v33 }
  0xeb   :  { %2154 = vmatpush1.bf16.msra.mxu0 %v3927_v34  ;;  %v4085_v34 = vld [vmem:[%s5474_s3 + $0xc4] ss:$16 sps:$4 sm:$0xff]  }
  0xec   :  { %2155 = vmatprep.subr.bf16.mxu0 %v3935_v35  ;;  %v4020_v35 = vld [vmem:[%s5472_s1 + $0x820] ss:$8 sps:$4 sm:$0xff]   ;;  %2686 = vmatprep.subr.bf16.mxu1 %v4085_v34 }
  0xef   :  { %2156 = vmatpush1.bf16.msra.mxu0 %v3933_v36  ;;  %v4025_v36 = vld [vmem:[%s5472_s1 + $0x834] ss:$8 sps:$4 sm:$0xff]  }
  0xf0   :  { %2157 = vmatprep.subr.bf16.mxu0 %v3941_v37  ;;  %v4083_v37 = vld [vmem:[%s5474_s3 + $0xc0] ss:$16 sps:$4 sm:$0xff]  }
  0xf1   :  { %2687 = vmatpush1.bf16.msra.mxu1 %v4083_v37 }
  0xf3   :  { %2158 = vmatpush1.bf16.msra.mxu0 %v3939_v38  ;;  %v4088_v38 = vld [vmem:[%s5474_s3 + $0xe4] ss:$16 sps:$4 sm:$0xff]  }
  0xf4   :  { %2159 = vmatprep.subr.bf16.mxu0 %v3947_v39  ;;  %v4023_v39 = vld [vmem:[%s5472_s1 + $0x830] ss:$8 sps:$4 sm:$0xff]   ;;  %2688 = vmatprep.subr.bf16.mxu1 %v4088_v38 }
  0xf7   :  { %2160 = vmatpush1.bf16.msra.mxu0 %v3945_v40  ;;  %v4028_v40 = vld [vmem:[%s5472_s1 + $0x844] ss:$8 sps:$4 sm:$0xff]  }
  0xf8   :  { %2161 = vmatprep.subr.bf16.mxu0 %v3953_v41  ;;  %v4086_v41 = vld [vmem:[%s5474_s3 + $0xe0] ss:$16 sps:$4 sm:$0xff]  }
  0xf9   :  { %2689 = vmatpush1.bf16.msra.mxu1 %v4086_v41 }
  0xfb   :  { %2162 = vmatpush1.bf16.msra.mxu0 %v3951_v42  ;;  %v4091_v42 = vld [vmem:[%s5474_s3 + $0x104] ss:$16 sps:$4 sm:$0xff]  }
  0xfc   :  { %2163 = vmatprep.subr.bf16.mxu0 %v3959_v43  ;;  %v4026_v43 = vld [vmem:[%s5472_s1 + $0x840] ss:$8 sps:$4 sm:$0xff]   ;;  %2690 = vmatprep.subr.bf16.mxu1 %v4091_v42 }
  0xff   :  { %2164 = vmatpush1.bf16.msra.mxu0 %v3957_v44  ;;  %v4031_v44 = vld [vmem:[%s5472_s1 + $0x854] ss:$8 sps:$4 sm:$0xff]  }
 0x100   :  { %2176 = vmatprep.subr.bf16.mxu0 %v3965_v45  ;;  %v4089_v45 = vld [vmem:[%s5474_s3 + $0x100] ss:$16 sps:$4 sm:$0xff]  }
 0x101   :  { %2691 = vmatpush1.bf16.msra.mxu1 %v4089_v45 }
 0x102   :  { %2166 = vmatmul.mubr.bf16.vlgmr.msra.gmra.mrb[0].mxu0 %v3960_v46  ;;  %v4094_v46 = vld [vmem:[%s5474_s3 + $0x124] ss:$16 sps:$4 sm:$0xff]  }
 0x103   :  { %2177 = vmatpush1.bf16.msra.mxu0 %v3963_v47  ;;  %2208 = vmatprep.mubr.bf16.mxu0 %v4013_v48  ;;  %v4029_v47 = vld [vmem:[%s5472_s1 + $0x850] ss:$8 sps:$4 sm:$0xff]   ;;  %v4034_v48 = vld [vmem:[%s5472_s1 + $0x864] ss:$8 sps:$4 sm:$0xff]  }
 0x104   :  { %2178 = vmatprep.subr.bf16.mxu0 %v3968_v49  ;;  %v4092_v49 = vld [vmem:[%s5474_s3 + $0x120] ss:$16 sps:$4 sm:$0xff]   ;;  %2692 = vmatprep.subr.bf16.mxu1 %v4094_v46 }
 0x105   :  { %2693 = vmatpush1.bf16.msra.mxu1 %v4092_v49  ;;  %v4118_v49 = vld [vmem:[%s5474_s3 + $0x2c] ss:$16 sps:$4 sm:$0xff]  }
 0x107   :  { %2179 = vmatpush1.bf16.msra.mxu0 %v3966_v50  ;;  %v4097_v50 = vld [vmem:[%s5474_s3 + $0x144] ss:$16 sps:$4 sm:$0xff]  }
 0x108   :  { %2180 = vmatprep.subr.bf16.mxu0 %v3971_v51  ;;  %v4032_v51 = vld [vmem:[%s5472_s1 + $0x860] ss:$8 sps:$4 sm:$0xff]   ;;  %2694 = vmatprep.subr.bf16.mxu1 %v4097_v50 }
 0x109   :  { %v4116_v50 = vld [vmem:[%s5474_s3 + $0x28] ss:$16 sps:$4 sm:$0xff]  }
 0x10b   :  { %2181 = vmatpush1.bf16.msra.mxu0 %v3969_v52  ;;  %v4037_v52 = vld [vmem:[%s5472_s1 + $0x874] ss:$8 sps:$4 sm:$0xff]  }
 0x10c   :  { %2182 = vmatprep.subr.bf16.mxu0 %v3974_v53  ;;  %v4095_v53 = vld [vmem:[%s5474_s3 + $0x140] ss:$16 sps:$4 sm:$0xff]  }
 0x10d   :  { %2695 = vmatpush1.bf16.msra.mxu1 %v4095_v53  ;;  %v4124_v53 = vld [vmem:[%s5474_s3 + $0x6c] ss:$16 sps:$4 sm:$0xff]  }
 0x10f   :  { %2183 = vmatpush1.bf16.msra.mxu0 %v3972_v54  ;;  %v4100_v54 = vld [vmem:[%s5474_s3 + $0x164] ss:$16 sps:$4 sm:$0xff]  }
 0x110   :  { %2184 = vmatprep.subr.bf16.mxu0 %v3977_v55  ;;  %v4035_v55 = vld [vmem:[%s5472_s1 + $0x870] ss:$8 sps:$4 sm:$0xff]   ;;  %2696 = vmatprep.subr.bf16.mxu1 %v4100_v54 }
 0x111   :  { %v4122_v54 = vld [vmem:[%s5474_s3 + $0x68] ss:$16 sps:$4 sm:$0xff]  }
 0x113   :  { %2185 = vmatpush1.bf16.msra.mxu0 %v3975_v56  ;;  %v4040_v56 = vld [vmem:[%s5472_s1 + $0x884] ss:$8 sps:$4 sm:$0xff]  }
 0x114   :  { %2186 = vmatprep.subr.bf16.mxu0 %v3980_v57  ;;  %v4098_v57 = vld [vmem:[%s5474_s3 + $0x160] ss:$16 sps:$4 sm:$0xff]  }
 0x115   :  { %2697 = vmatpush1.bf16.msra.mxu1 %v4098_v57  ;;  %v4130_v57 = vld [vmem:[%s5474_s3 + $0xac] ss:$16 sps:$4 sm:$0xff]  }
 0x117   :  { %2187 = vmatpush1.bf16.msra.mxu0 %v3978_v58  ;;  %v4103_v58 = vld [vmem:[%s5474_s3 + $0x184] ss:$16 sps:$4 sm:$0xff]  }
 0x118   :  { %2188 = vmatprep.subr.bf16.mxu0 %v3983_v59  ;;  %v4038_v59 = vld [vmem:[%s5472_s1 + $0x880] ss:$8 sps:$4 sm:$0xff]   ;;  %2698 = vmatprep.subr.bf16.mxu1 %v4103_v58 }
 0x119   :  { %v4128_v58 = vld [vmem:[%s5474_s3 + $0xa8] ss:$16 sps:$4 sm:$0xff]  }
 0x11b   :  { %2189 = vmatpush1.bf16.msra.mxu0 %v3981_v60  ;;  %v4043_v60 = vld [vmem:[%s5472_s1 + $0x894] ss:$8 sps:$4 sm:$0xff]  }
 0x11c   :  { %2190 = vmatprep.subr.bf16.mxu0 %v3986_v61  ;;  %v4101_v61 = vld [vmem:[%s5474_s3 + $0x180] ss:$16 sps:$4 sm:$0xff]  }
 0x11d   :  { %2699 = vmatpush1.bf16.msra.mxu1 %v4101_v61  ;;  %v4136_v61 = vld [vmem:[%s5474_s3 + $0xec] ss:$16 sps:$4 sm:$0xff]  }
 0x11f   :  { %2191 = vmatpush1.bf16.msra.mxu0 %v3984_v62  ;;  %v4106_v62 = vld [vmem:[%s5474_s3 + $0x1a4] ss:$16 sps:$4 sm:$0xff]  }
 0x120   :  { %2192 = vmatprep.subr.bf16.mxu0 %v3989_v63  ;;  %v4041_v63 = vld [vmem:[%s5472_s1 + $0x890] ss:$8 sps:$4 sm:$0xff]   ;;  %2700 = vmatprep.subr.bf16.mxu1 %v4106_v62 }
 0x121   :  { %v4134_v62 = vld [vmem:[%s5474_s3 + $0xe8] ss:$16 sps:$4 sm:$0xff]  }
 0x123   :  { %2193 = vmatpush1.bf16.msra.mxu0 %v3987_v0  ;;  %v4046_v0 = vld [vmem:[%s5472_s1 + $0x8a4] ss:$8 sps:$4 sm:$0xff]  }
 0x124   :  { %2194 = vmatprep.subr.bf16.mxu0 %v3992_v1  ;;  %v4104_v1 = vld [vmem:[%s5474_s3 + $0x1a0] ss:$16 sps:$4 sm:$0xff]  }
 0x125   :  { %2701 = vmatpush1.bf16.msra.mxu1 %v4104_v1  ;;  %v4142_v1 = vld [vmem:[%s5474_s3 + $0x12c] ss:$16 sps:$4 sm:$0xff]  }
 0x127   :  { %2195 = vmatpush1.bf16.msra.mxu0 %v3990_v2  ;;  %v4044_v2 = vld [vmem:[%s5472_s1 + $0x8a0] ss:$8 sps:$4 sm:$0xff]  }
 0x128   :  { %2196 = vmatprep.subr.bf16.mxu0 %v3995_v3  ;;  %v4049_v3 = vld [vmem:[%s5472_s1 + $0x8b4] ss:$8 sps:$4 sm:$0xff]  }
 0x12b   :  { %2197 = vmatpush1.bf16.msra.mxu0 %v3993_v4  ;;  %v4047_v4 = vld [vmem:[%s5472_s1 + $0x8b0] ss:$8 sps:$4 sm:$0xff]  }
 0x12c   :  { %2198 = vmatprep.subr.bf16.mxu0 %v3998_v5  ;;  %v4052_v5 = vld [vmem:[%s5472_s1 + $0x8c4] ss:$8 sps:$4 sm:$0xff]  }
 0x12f   :  { %2199 = vmatpush1.bf16.msra.mxu0 %v3996_v6  ;;  %v4050_v6 = vld [vmem:[%s5472_s1 + $0x8c0] ss:$8 sps:$4 sm:$0xff]  }
 0x130   :  { %2200 = vmatprep.subr.bf16.mxu0 %v4001_v7  ;;  %v4055_v7 = vld [vmem:[%s5472_s1 + $0x8d4] ss:$8 sps:$4 sm:$0xff]  }
 0x133   :  { %2201 = vmatpush1.bf16.msra.mxu0 %v3999_v8  ;;  %v4053_v8 = vld [vmem:[%s5472_s1 + $0x8d0] ss:$8 sps:$4 sm:$0xff]  }
 0x134   :  { %2202 = vmatprep.subr.bf16.mxu0 %v4004_v9  ;;  %v4058_v9 = vld [vmem:[%s5472_s1 + $0x8e4] ss:$8 sps:$4 sm:$0xff]  }
 0x137   :  { %2203 = vmatpush1.bf16.msra.mxu0 %v4002_v13  ;;  %v4062_v13 = vld [vmem:[%s5473_s0 + $0x40] ss:$72 sps:$4 sm:$0xff]  }
 0x138   :  { %2204 = vmatprep.subr.bf16.mxu0 %v4007_v14 }
 0x13b   :  { %2205 = vmatpush1.bf16.msra.mxu0 %v4005_v17 }
 0x13c   :  { %2206 = vmatprep.subr.bf16.mxu0 %v4010_v18  ;;  %v4109_v18 = vld [vmem:[%s5474_s3 + $0x1c4] ss:$16 sps:$4 sm:$0xff]  }
 0x13d   :  { %2702 = vmatprep.subr.bf16.mxu1 %v4109_v18  ;;  %v4164_v18 = vld [vmem:[%s5475_s5 + $0x8] sm:$0xff]  }
 0x13e   :  { %2703 = vmatpush1.bf16.msra.mxu1 %v4107_v19  ;;  %v4165_v19 = vld [vmem:[%s5475_s5 + $0x50] sm:$0xff]  }
 0x13f   :  { %2207 = vmatpush1.bf16.msra.mxu0 %v4008_v21  ;;  %v4110_v21 = vld [vmem:[%s5474_s3 + $0x1e0] ss:$16 sps:$4 sm:$0xff]   ;;  %2704 = vmatprep.subr.bf16.mxu1 %v4112_v20 }
 0x140   :  { %2219 = vmatprep.subr.bf16.mxu0 %v4016_v22  ;;  %v4115_v22 = vld [vmem:[%s5474_s3 + $0xc] ss:$16 sps:$4 sm:$0xff]   ;;  %v4166_v20 = vld [vmem:[%s5475_s5 + $0x10] sm:$0xff]  }
 0x142   :  { %2209 = vmatmul.mubr.bf16.vlgmr.msra.gmra.mrb[0].mxu0 %v4011_v25  ;;  %2705 = vmatpush1.bf16.msra.mxu1 %v4110_v21  ;;  %v337_v25 = vsub.s32 0, %v5250_v24  ;;  %v4167_v21 = vld [vmem:[%s5475_s5 + $0x58] sm:$0xff]  }
 0x143   :  { %2220 = vmatpush1.bf16.msra.mxu0 %v4014_v26  ;;  %2251 = vmatprep.mubr.bf16.mxu0 %v4064_v28  ;;  %v333_v26 = vld [vmem:[%s5476_s2] sm:$0x3] }
 0x144   :  { %2221 = vmatprep.subr.bf16.mxu0 %v4019_v27  ;;  %2717 = vmatprep.subr.bf16.mxu1 %v4115_v22  ;;  %v341_v27 = vsub.s32 1, %v5250_v24  ;;  %v338_v28 = vrot.slane %v333_v26, %v337_v25  ;;  %v4168_v22 = vld [vmem:[%s5475_s5 + $0x18] sm:$0xff]  }
 0x146   :  { %v342_v29 = vrot.slane %v333_v26, %v341_v27  ;;  %v4170_v26 = vld [vmem:[%s5475_s5 + $0x20] sm:$0xff]  }
 0x147   :  { %2222 = vmatpush1.bf16.msra.mxu0 %v4017_v30 }
 0x148   :  { %2223 = vmatprep.subr.bf16.mxu0 %v4022_v32 }
 0x14b   :  { %2224 = vmatpush1.bf16.msra.mxu0 %v4020_v35 }
 0x14c   :  { %2225 = vmatprep.subr.bf16.mxu0 %v4025_v36 }
 0x14f   :  { %2226 = vmatpush1.bf16.msra.mxu0 %v4023_v39 }
 0x150   :  { %2227 = vmatprep.subr.bf16.mxu0 %v4028_v40 }
 0x153   :  { %2228 = vmatpush1.bf16.msra.mxu0 %v4026_v43 }
 0x154   :  { %2229 = vmatprep.subr.bf16.mxu0 %v4031_v44 }
 0x157   :  { %2230 = vmatpush1.bf16.msra.mxu0 %v4029_v47 }
 0x158   :  { %2231 = vmatprep.subr.bf16.mxu0 %v4034_v48  ;;  %v4113_v48 = vld [vmem:[%s5474_s3 + $0x8] ss:$16 sps:$4 sm:$0xff]  }
 0x15b   :  { %2232 = vmatpush1.bf16.msra.mxu0 %v4032_v51  ;;  %v4121_v51 = vld [vmem:[%s5474_s3 + $0x4c] ss:$16 sps:$4 sm:$0xff]  }
 0x15c   :  { %2233 = vmatprep.subr.bf16.mxu0 %v4037_v52  ;;  %v4119_v52 = vld [vmem:[%s5474_s3 + $0x48] ss:$16 sps:$4 sm:$0xff]  }
 0x15f   :  { %2234 = vmatpush1.bf16.msra.mxu0 %v4035_v55  ;;  %v4127_v55 = vld [vmem:[%s5474_s3 + $0x8c] ss:$16 sps:$4 sm:$0xff]  }
 0x160   :  { %2235 = vmatprep.subr.bf16.mxu0 %v4040_v56  ;;  %v4125_v56 = vld [vmem:[%s5474_s3 + $0x88] ss:$16 sps:$4 sm:$0xff]  }
 0x163   :  { %2236 = vmatpush1.bf16.msra.mxu0 %v4038_v59  ;;  %v4133_v59 = vld [vmem:[%s5474_s3 + $0xcc] ss:$16 sps:$4 sm:$0xff]  }
 0x164   :  { %2237 = vmatprep.subr.bf16.mxu0 %v4043_v60  ;;  %v4131_v60 = vld [vmem:[%s5474_s3 + $0xc8] ss:$16 sps:$4 sm:$0xff]  }
 0x167   :  { %2238 = vmatpush1.bf16.msra.mxu0 %v4041_v63  ;;  %v4139_v63 = vld [vmem:[%s5474_s3 + $0x10c] ss:$16 sps:$4 sm:$0xff]  }
 0x168   :  { %2239 = vmatprep.subr.bf16.mxu0 %v4046_v0  ;;  %v4137_v0 = vld [vmem:[%s5474_s3 + $0x108] ss:$16 sps:$4 sm:$0xff]  }
 0x16b   :  { %2240 = vmatpush1.bf16.msra.mxu0 %v4044_v2  ;;  %v4140_v2 = vld [vmem:[%s5474_s3 + $0x128] ss:$16 sps:$4 sm:$0xff]  }
 0x16c   :  { %2241 = vmatprep.subr.bf16.mxu0 %v4049_v3  ;;  %v4145_v3 = vld [vmem:[%s5474_s3 + $0x14c] ss:$16 sps:$4 sm:$0xff]  }
 0x16f   :  { %2242 = vmatpush1.bf16.msra.mxu0 %v4047_v4  ;;  %v4143_v4 = vld [vmem:[%s5474_s3 + $0x148] ss:$16 sps:$4 sm:$0xff]  }
 0x170   :  { %2243 = vmatprep.subr.bf16.mxu0 %v4052_v5  ;;  %v4148_v5 = vld [vmem:[%s5474_s3 + $0x16c] ss:$16 sps:$4 sm:$0xff]  }
 0x173   :  { %2244 = vmatpush1.bf16.msra.mxu0 %v4050_v6  ;;  %v4146_v6 = vld [vmem:[%s5474_s3 + $0x168] ss:$16 sps:$4 sm:$0xff]  }
 0x174   :  { %2245 = vmatprep.subr.bf16.mxu0 %v4055_v7  ;;  %v4151_v7 = vld [vmem:[%s5474_s3 + $0x18c] ss:$16 sps:$4 sm:$0xff]  }
 0x177   :  { %2246 = vmatpush1.bf16.msra.mxu0 %v4053_v8  ;;  %v4149_v8 = vld [vmem:[%s5474_s3 + $0x188] ss:$16 sps:$4 sm:$0xff]  }
 0x178   :  { %2247 = vmatprep.subr.bf16.mxu0 %v4058_v9  ;;  %v4154_v9 = vld [vmem:[%s5474_s3 + $0x1ac] ss:$16 sps:$4 sm:$0xff]  }
 0x17b   :  { %2248 = vmatpush1.bf16.msra.mxu0 %v4056_v10  ;;  %v4152_v10 = vld [vmem:[%s5474_s3 + $0x1a8] ss:$16 sps:$4 sm:$0xff]  }
 0x17c   :  { %2249 = vmatprep.subr.bf16.mxu0 %v4061_v11  ;;  %v4157_v11 = vld [vmem:[%s5474_s3 + $0x1cc] ss:$16 sps:$4 sm:$0xff]  }
 0x17f   :  { %2250 = vmatpush1.bf16.msra.mxu0 %v4059_v12  ;;  %v4155_v12 = vld [vmem:[%s5474_s3 + $0x1c8] ss:$16 sps:$4 sm:$0xff]  }
 0x182   :  { %2252 = vmatmul.mubr.bf16.vlgmr.msra.gmra.mrb[0].mxu0 %v4062_v13  ;;  %v4160_v13 = vld [vmem:[%s5474_s3 + $0x1ec] ss:$16 sps:$4 sm:$0xff]  }
 0x19a   :  { %v1995_v14 = vpop.f32.mrb[0].mxu1 }
 0x19b   :  { %v1997_v15 = vpop.f32.mrb[1].mxu1  ;;  %v3570_v30 = vadd.f32 %v1995_v14, %v338_v28  ;;  %v4158_v14 = vld [vmem:[%s5474_s3 + $0x1e8] ss:$16 sps:$4 sm:$0xff]  }
 0x19c   :  { %v1999_v16 = vpop.f32.mrb[2].mxu1  ;;  %v3572_v31 = vadd.f32 %v1997_v15, %v342_v29  ;;  %v4161_v15 = vld [vmem:[%s5475_s5 + $0x40] sm:$0xff]  }
 0x19d   :  { %v2001_v17 = vpop.f32.mrb[3].mxu1  ;;  %v3574_v33 = vadd.f32 %v1999_v16, %v338_v28  ;;  %v4162_v16 = vld [vmem:[%s5475_s5] sm:$0xff]   ;;  %v4171_v28 = vld [vmem:[%s5475_s5 + $0x68] sm:$0xff]  }
 0x19e   :  { %v3576_v36 = vadd.f32 %v2001_v17, %v342_v29  ;;  %v4163_v17 = vld [vmem:[%s5475_s5 + $0x48] sm:$0xff]  }
 0x19f   :  { %v4172_v29 = vld [vmem:[%s5475_s5 + $0x28] sm:$0xff]  }
 0x255   :  { %v2253_v32 = vpop.f32.mrb[0].mxu0 }
 0x256   :  { %v3571_v34 = vadd.f32 %v3570_v30, %v2253_v32  ;;  %v2255_v35 = vpop.f32.mrb[1].mxu0  ;;  %v4173_v30 = vld [vmem:[%s5475_s5 + $0x70] sm:$0xff]   ;;  %v4175_v32 = vld [vmem:[%s5475_s5 + $0x78] sm:$0xff]  }
 0x257   :  { %v3573_v37 = vadd.f32 %v3572_v31, %v2255_v35  ;;  %v2257_v38 = vpop.f32.mrb[2].mxu0  ;;  %v4174_v31 = vld [vmem:[%s5475_s5 + $0x30] sm:$0xff]   ;;  %v2332_v35 = vld [vmem:[%s5477_s4] sm:$0xf] }
 0x258   :  { %v3575_v39 = vadd.f32 %v3574_v33, %v2257_v38  ;;  %v2259_v40 = vpop.f32.mrb[3].mxu0  ;;  %v2262_v42 = vmax.f32 %v3571_v34, 0.0  ;;  %v4176_v33 = vld [vmem:[%s5475_s5 + $0x38] sm:$0xff]   ;;  %v4177_v34 = vld [vmem:[%s5475_s5 + $0xc0] sm:$0xff]  }
 0x259   :  { %v3577_v41 = vadd.f32 %v3576_v36, %v2259_v40  ;;  %v2263_v44 = vmax.f32 %v3573_v37, 0.0  ;;  %v2337_v36 = vrot.slane %v2332_v35, %v337_v25  ;;  %v2341_v37 = vrot.slane %v2332_v35, %v341_v27  ;;  %v4178_v25 = vld [vmem:[%s5475_s5 + $0x80] sm:$0xff]   ;;  %v4179_v27 = vld [vmem:[%s5475_s5 + $0xc8] sm:$0xff]  }
 0x25a   :  { %v2264_v43 = vmax.f32 %v3575_v39, 0.0 }
 0x25b   :  { %v2265_v45 = vmax.f32 %v3577_v41, 0.0 }
 0x25c   :  { %v5261_v46 = vpack.c.bf16 %v2264_v43, %v2262_v42 }
 0x25d   :  { %v2267_v47 = vpack.c.bf16 %v2265_v45, %v2263_v44 }
 0x25f   :  { %2706 = vmatprep.mubr.bf16.mxu1 %v2267_v47 }
 0x260   :  { %2707 = vmatmul.mubr.bf16.vlgmr.msra.gmra.mrb[4].mxu1 %v5261_v46 }
 0x261   :  { %2718 = vmatpush1.bf16.msra.mxu1 %v4113_v48  ;;  %2749 = vmatprep.mubr.bf16.mxu1 %v2267_v47 }
 0x262   :  { %2719 = vmatprep.subr.bf16.mxu1 %v4118_v49 }
 0x265   :  { %2720 = vmatpush1.bf16.msra.mxu1 %v4116_v50 }
 0x266   :  { %2721 = vmatprep.subr.bf16.mxu1 %v4121_v51 }
 0x269   :  { %2722 = vmatpush1.bf16.msra.mxu1 %v4119_v52  ;;  %v4180_v52 = vld [vmem:[%s5475_s5 + $0x88] sm:$0xff]  }
 0x26a   :  { %2723 = vmatprep.subr.bf16.mxu1 %v4124_v53  ;;  %v4181_v53 = vld [vmem:[%s5475_s5 + $0xd0] sm:$0xff]  }
 0x26d   :  { %2724 = vmatpush1.bf16.msra.mxu1 %v4122_v54  ;;  %v4182_v54 = vld [vmem:[%s5475_s5 + $0x90] sm:$0xff]  }
 0x26e   :  { %2725 = vmatprep.subr.bf16.mxu1 %v4127_v55  ;;  %v4183_v55 = vld [vmem:[%s5475_s5 + $0xd8] sm:$0xff]  }
 0x271   :  { %2726 = vmatpush1.bf16.msra.mxu1 %v4125_v56  ;;  %v4184_v56 = vld [vmem:[%s5475_s5 + $0x98] sm:$0xff]  }
 0x272   :  { %2727 = vmatprep.subr.bf16.mxu1 %v4130_v57  ;;  %v4185_v57 = vld [vmem:[%s5475_s5 + $0xe0] sm:$0xff]  }
 0x275   :  { %2728 = vmatpush1.bf16.msra.mxu1 %v4128_v58  ;;  %v4186_v58 = vld [vmem:[%s5475_s5 + $0xa0] sm:$0xff]  }
 0x276   :  { %2729 = vmatprep.subr.bf16.mxu1 %v4133_v59  ;;  %v4187_v59 = vld [vmem:[%s5475_s5 + $0xe8] sm:$0xff]  }
 0x279   :  { %2730 = vmatpush1.bf16.msra.mxu1 %v4131_v60  ;;  %v4188_v60 = vld [vmem:[%s5475_s5 + $0xa8] sm:$0xff]  }
 0x27a   :  { %2731 = vmatprep.subr.bf16.mxu1 %v4136_v61  ;;  %v4189_v61 = vld [vmem:[%s5475_s5 + $0xf0] sm:$0xff]  }
 0x27d   :  { %2732 = vmatpush1.bf16.msra.mxu1 %v4134_v62  ;;  %v4190_v62 = vld [vmem:[%s5475_s5 + $0xb0] sm:$0xff]  }
 0x27e   :  { %2733 = vmatprep.subr.bf16.mxu1 %v4139_v63  ;;  %v4191_v63 = vld [vmem:[%s5475_s5 + $0xf8] sm:$0xff]  }
 0x281   :  { %2734 = vmatpush1.bf16.msra.mxu1 %v4137_v0  ;;  %v4192_v0 = vld [vmem:[%s5475_s5 + $0xb8] sm:$0xff]  }
 0x282   :  { %2735 = vmatprep.subr.bf16.mxu1 %v4142_v1  ;;  %v2344_v1 = vsub.s32 2, %v5250_v24 }
 0x285   :  { %2736 = vmatpush1.bf16.msra.mxu1 %v4140_v2  ;;  %v2348_v2 = vsub.s32 3, %v5250_v24 }
 0x286   :  { %2737 = vmatprep.subr.bf16.mxu1 %v4145_v3  ;;  %v2345_v3 = vrot.slane %v2332_v35, %v2344_v1 }
 0x289   :  { %2738 = vmatpush1.bf16.msra.mxu1 %v4143_v4  ;;  %v2349_v4 = vrot.slane %v2332_v35, %v2348_v2 }
 0x28a   :  { %2739 = vmatprep.subr.bf16.mxu1 %v4148_v5 }
 0x28d   :  { %2740 = vmatpush1.bf16.msra.mxu1 %v4146_v6 }
 0x28e   :  { %2741 = vmatprep.subr.bf16.mxu1 %v4151_v7 }
 0x291   :  { %2742 = vmatpush1.bf16.msra.mxu1 %v4149_v8 }
 0x292   :  { %2743 = vmatprep.subr.bf16.mxu1 %v4154_v9 }
 0x295   :  { %2744 = vmatpush1.bf16.msra.mxu1 %v4152_v10 }
 0x296   :  { %2745 = vmatprep.subr.bf16.mxu1 %v4157_v11 }
 0x299   :  { %2746 = vmatpush1.bf16.msra.mxu1 %v4155_v12 }
 0x29a   :  { %2747 = vmatprep.subr.bf16.mxu1 %v4160_v13 }
 0x29d   :  { %2748 = vmatpush1.bf16.msra.mxu1 %v4158_v14 }
 0x29e   :  { %3526 = vmatprep.subr.bf16.mxu1 %v4161_v15 }
 0x2a0   :  { %2750 = vmatmul.mubr.bf16.vlgmr.msra.gmra.mrb[8].mxu1 %v5261_v46 }
 0x2a1   :  { %3527 = vmatpush3.bf16.msra.mxu1 %v4162_v16 }
 0x2a2   :  { %3528 = vmatprep.subr.bf16.mxu1 %v4163_v17 }
 0x2a5   :  { %3529 = vmatpush3.bf16.msra.mxu1 %v4164_v18 }
 0x2a6   :  { %3530 = vmatprep.subr.bf16.mxu1 %v4165_v19 }
 0x2a9   :  { %3531 = vmatpush3.bf16.msra.mxu1 %v4166_v20 }
 0x2aa   :  { %3532 = vmatprep.subr.bf16.mxu1 %v4167_v21 }
 0x2ad   :  { %3533 = vmatpush3.bf16.msra.mxu1 %v4168_v22 }
 0x2ae   :  { %3534 = vmatprep.subr.bf16.mxu1 %v4169_v23 }
 0x2b1   :  { %3535 = vmatpush3.bf16.msra.mxu1 %v4170_v26  ;;  %v3493_v26 = vld [vmem:[%s5478_s6] ss:$0 sm:$0xff] }
 0x2b2   :  { %3536 = vmatprep.subr.bf16.mxu1 %v4171_v28 }
 0x2b5   :  { %3537 = vmatpush3.bf16.msra.mxu1 %v4172_v29 }
 0x2b6   :  { %3538 = vmatprep.subr.bf16.mxu1 %v4173_v30 }
 0x2b9   :  { %3539 = vmatpush3.bf16.msra.mxu1 %v4174_v31 }
 0x2ba   :  { %3540 = vmatprep.subr.bf16.mxu1 %v4175_v32 }
 0x2bd   :  { %3541 = vmatpush3.bf16.msra.mxu1 %v4176_v33 }
 0x2be   :  { %3548 = vmatprep.subr.bf16.mxu1 %v4177_v34 }
 0x333   :  { %v2708_v38 = vpop.f32.mrb[4].mxu1 }
 0x334   :  { %v2709_v39 = vadd.f32 %v2708_v38, %v2337_v36  ;;  %v2710_v40 = vpop.f32.mrb[5].mxu1 }
 0x335   :  { %v2711_v41 = vadd.f32 %v2710_v40, %v2341_v37  ;;  %v2712_v42 = vpop.f32.mrb[6].mxu1 }
 0x336   :  { %v2713_v43 = vadd.f32 %v2712_v42, %v2337_v36  ;;  %v2714_v44 = vpop.f32.mrb[7].mxu1  ;;  %v2760_v46 = vmax.f32 %v2709_v39, 0.0 }
 0x337   :  { %v2715_v45 = vadd.f32 %v2714_v44, %v2341_v37  ;;  %v2761_v48 = vmax.f32 %v2711_v41, 0.0 }
 0x338   :  { %v2764_v47 = vmax.f32 %v2713_v43, 0.0 }
 0x339   :  { %v2765_v49 = vmax.f32 %v2715_v45, 0.0 }
 0x33a   :  { %v2768_v50 = vpack.c.bf16 %v2764_v47, %v2760_v46 }
 0x33b   :  { %v2769_v51 = vpack.c.bf16 %v2765_v49, %v2761_v48 }
 0x33d   :  { %3067 = vmatprep.mubr.bf16.mxu1 %v2769_v51 }
 0x33e   :  { %3068 = vmatmul.mubr.bf16.vlgmr.msra.gmra.mrb[12].mxu1 %v2768_v50 }
 0x33f   :  { %3549 = vmatpush3.bf16.msra.mxu1 %v4178_v25 }
 0x340   :  { %3550 = vmatprep.subr.bf16.mxu1 %v4179_v27 }
 0x343   :  { %3551 = vmatpush3.bf16.msra.mxu1 %v4180_v52 }
 0x344   :  { %3552 = vmatprep.subr.bf16.mxu1 %v4181_v53 }
 0x347   :  { %3553 = vmatpush3.bf16.msra.mxu1 %v4182_v54 }
 0x348   :  { %3554 = vmatprep.subr.bf16.mxu1 %v4183_v55 }
 0x34b   :  { %3555 = vmatpush3.bf16.msra.mxu1 %v4184_v56 }
 0x34c   :  { %3556 = vmatprep.subr.bf16.mxu1 %v4185_v57 }
 0x34f   :  { %3557 = vmatpush3.bf16.msra.mxu1 %v4186_v58 }
 0x350   :  { %3558 = vmatprep.subr.bf16.mxu1 %v4187_v59 }
 0x353   :  { %3559 = vmatpush3.bf16.msra.mxu1 %v4188_v60 }
 0x354   :  { %3560 = vmatprep.subr.bf16.mxu1 %v4189_v61 }
 0x357   :  { %3561 = vmatpush3.bf16.msra.mxu1 %v4190_v62 }
 0x358   :  { %3562 = vmatprep.subr.bf16.mxu1 %v4191_v63 }
 0x35b   :  { %3563 = vmatpush3.bf16.msra.mxu1 %v4192_v0 }
 0x373   :  { %v2751_v5 = vpop.f32.mrb[8].mxu1 }
 0x374   :  { %v2752_v6 = vadd.f32 %v2751_v5, %v2345_v3  ;;  %v2753_v7 = vpop.f32.mrb[9].mxu1 }
 0x375   :  { %v2754_v8 = vadd.f32 %v2753_v7, %v2349_v4  ;;  %v2755_v9 = vpop.f32.mrb[10].mxu1 }
 0x376   :  { %v2756_v10 = vadd.f32 %v2755_v9, %v2345_v3  ;;  %v2757_v11 = vpop.f32.mrb[11].mxu1  ;;  %v2762_v13 = vmax.f32 %v2752_v6, 0.0 }
 0x377   :  { %v2758_v12 = vadd.f32 %v2757_v11, %v2349_v4  ;;  %v2763_v15 = vmax.f32 %v2754_v8, 0.0 }
 0x378   :  { %v2766_v14 = vmax.f32 %v2756_v10, 0.0 }
 0x379   :  { %v2767_v16 = vmax.f32 %v2758_v12, 0.0 }
 0x37a   :  { %v2770_v17 = vpack.c.bf16 %v2766_v14, %v2762_v13 }
 0x37b   :  { %v2771_v18 = vpack.c.bf16 %v2767_v16, %v2763_v15 }
 0x37d   :  { %3108 = vmatprep.mubr.bf16.mxu1 %v2771_v18 }
 0x37e   :  { %3109 = vmatmul.mubr.bf16.vlgmr.msra.gmra.mrb[16].mxu1 %v2770_v17 }
 0x411   :  { %v3542_v19 = vpop.f32.mrb[12].mxu1 }
 0x412   :  { %v3543_v24 = vpop.f32.mrb[13].mxu1 }
 0x413   :  { %v3544_v20 = vadd.f32 %v3543_v24, %v3542_v19  ;;  %v3545_v21 = vpop.f32.mrb[14].mxu1 }
 0x414   :  { %v3546_v22 = vpop.f32.mrb[15].mxu1 }
 0x415   :  { %v3547_v23 = vadd.f32 %v3546_v22, %v3545_v21  ;;  %v3070_v30 = vadd.f32 %v3544_v20, %v3493_v26 }
 0x417   :  { %v3073_v34 = vadd.f32 %v3547_v23, %v3493_v26 }
 0x451   :  { %v3564_v28 = vpop.f32.mrb[16].mxu1 }
 0x452   :  { %v3565_v29 = vpop.f32.mrb[17].mxu1 }
 0x453   :  { %v3566_v31 = vadd.f32 %v3565_v29, %v3564_v28  ;;  %v3567_v32 = vpop.f32.mrb[18].mxu1 }
 0x454   :  { %v3568_v33 = vpop.f32.mrb[19].mxu1 }
 0x455   :  { %v3111_v35 = vadd.f32 %v3566_v31, %v3070_v30  ;;  %v3569_v36 = vadd.f32 %v3568_v33, %v3567_v32 }
 0x457   :  { %3117 = vst [vmem:[%s5479_s7] sm:$0xff] %v3111_v35  ;;  %v3114_v37 = vadd.f32 %v3569_v36, %v3073_v34 }
 0x459   :  { %3118 = vst [vmem:[%s5479_s7 + $0x8] sm:$0xff] %v3114_v37 }

</bundles_post_ra>
